<compile_context>
chip_gen: v5e
topology: v5e:2x2
jax: 0.10.0
libtpu: 0.0.40
codegen_flags: <defaults>
</compile_context>

<pallas_src>
import jax
import jax.numpy as jnp
from jax.experimental import pallas as pl
from jax.experimental.pallas import tpu as pltpu

D_MODEL = 32
N_HEADS = 4
HEAD_DIM = D_MODEL // N_HEADS
D_FF = 64
LN_EPS = 1e-5
NEG_INF = -1e30

# Row offsets of the (pre-transposed) weights inside the packed weight slab.
_R_SA_QKV = 0      # (32, 96)  self-attn fused QKV in_proj
_R_CA_Q = 32       # (32, 32)  cross-attn Q in_proj
_R_CA_KV = 64      # (32, 64)  cross-attn fused K/V in_proj
_R_SA_O = 96       # (32, 32)  self-attn out_proj
_R_CA_O = 128      # (32, 32)  cross-attn out_proj
_R_FF1 = 160       # (32, 64)  feed-forward linear_1
_R_FF2 = 192       # (64, 32)  feed-forward linear_2
_W_SLAB_ROWS = 256

# Row index of each bias vector inside the packed bias slab.
(_B_SA_QKV, _B_CA_Q, _B_CA_KV, _B_SA_O, _B_CA_O,
 _B_LN_W, _B_LN_B, _B_FF1, _B_FF2) = range(9)
_B_SLAB_ROWS = 16


# ---------------------------------------------------------------------------
# host-side parameter packing (pre-transpose + pack into two lane-dense slabs)
# ---------------------------------------------------------------------------
def _pack_params(params):
    (sa_w, sa_b, sa_ow, sa_ob, ca_w, ca_b, ca_ow, ca_ob,
     ln_w, ln_b, w1, b1, w2, b2) = params
    D = D_MODEL

    def pad_w(w):  # pad columns out to 128 lanes
        return jnp.pad(w, ((0, 0), (0, 128 - w.shape[1])))

    w_slab = jnp.concatenate([
        pad_w(sa_w.T),        # rows   0: 32  fused QKV (32, 96)
        pad_w(ca_w[:D].T),    # rows  32: 64  cross Q   (32, 32)
        pad_w(ca_w[D:].T),    # rows  64: 96  cross KV  (32, 64)
        pad_w(sa_ow.T),       # rows  96:128
        pad_w(ca_ow.T),       # rows 128:160
        pad_w(w1.T),          # rows 160:192
        pad_w(w2.T),          # rows 192:256
    ], axis=0).astype(jnp.float32)                # (256, 128)

    def pad_b(v):
        v = v.reshape(-1)
        return jnp.pad(v, (0, 128 - v.shape[0]))

    b_slab = jnp.stack([
        pad_b(sa_b),                   # fused QKV bias (96)
        pad_b(ca_b.reshape(-1)[:D]),   # cross Q bias   (32)
        pad_b(ca_b.reshape(-1)[D:]),   # cross K/V bias (64)
        pad_b(sa_ob), pad_b(ca_ob),
        pad_b(ln_w), pad_b(ln_b),
        pad_b(b1), pad_b(b2),
    ], axis=0)
    b_slab = jnp.pad(
        b_slab, ((0, _B_SLAB_ROWS - b_slab.shape[0]), (0, 0))
    ).astype(jnp.float32)                                      # (16, 128)
    return w_slab, b_slab


# ---------------------------------------------------------------------------
# Pallas kernel: full decoder block, whole batch, single invocation
# ---------------------------------------------------------------------------
def _make_decoder_kernel(B, Sd, Se):
    D, H, Hd = D_MODEL, N_HEADS, HEAD_DIM
    scale = 1.0 / float(Hd) ** 0.5

    def kernel(dec_ref, enc_ref, w_ref, b_ref, out_ref):
        f32 = jnp.float32
        x = dec_ref[...]        # (B*Sd, D)  decoder stream, batch folded into rows
        e = enc_ref[...]        # (B*Se, D)  encoder stream
        biases = b_ref[...]     # (16, 128)  packed bias slab (one load)

        gamma = biases[_B_LN_W, :D]
        beta = biases[_B_LN_B, :D]

        def layer_norm(y):
            mu = jnp.mean(y, axis=-1, keepdims=True)
            var = jnp.mean((y - mu) ** 2, axis=-1, keepdims=True)
            return (y - mu) * jax.lax.rsqrt(var + LN_EPS) * gamma + beta

        # additive causal mask, built once per kernel invocation (hoisted)
        rows = jax.lax.broadcasted_iota(jnp.int32, (B, Sd, Sd), 1)
        cols = jax.lax.broadcasted_iota(jnp.int32, (B, Sd, Sd), 2)
        causal_bias = jnp.where(cols <= rows, 0.0, NEG_INF).astype(f32)

        def attention(q3, k3, v3, bias):
            # q3: (B, Sq, D), k3/v3: (B, Sk, D).  Batched matmuls per head.
            Sq = q3.shape[1]
            outs = []
            for h in range(H):
                sl = slice(h * Hd, (h + 1) * Hd)
                s = jnp.einsum('bqd,bkd->bqk', q3[..., sl], k3[..., sl],
                               preferred_element_type=f32) * scale
                if bias is not None:
                    s = s + bias
                m = jnp.max(s, axis=-1, keepdims=True)
                p = jnp.exp(s - m)
                inv = pl.reciprocal(jnp.sum(p, axis=-1, keepdims=True),
                                    approx=True)
                o = jnp.einsum('bqk,bkd->bqd', p, v3[..., sl],
                               preferred_element_type=f32) * inv
                outs.append(o.reshape(B * Sq, Hd))
            return jnp.concatenate(outs, axis=-1)          # (B*Sq, D)

        # ---- masked self-attention (fused QKV projection) + add & norm ----
        qkv = (jnp.dot(x, w_ref[_R_SA_QKV:_R_SA_QKV + D, :3 * D],
                       preferred_element_type=f32) + biases[_B_SA_QKV, :3 * D])
        qkv3 = qkv.reshape(B, Sd, 3 * D)
        sa = attention(qkv3[..., :D], qkv3[..., D:2 * D], qkv3[..., 2 * D:],
                       causal_bias)
        sa = (jnp.dot(sa, w_ref[_R_SA_O:_R_SA_O + D, :D],
                      preferred_element_type=f32) + biases[_B_SA_O, :D])
        y = layer_norm(sa + x)

        # ---- cross-attention (fused K/V projection from encoder) + add & norm ----
        q = (jnp.dot(y, w_ref[_R_CA_Q:_R_CA_Q + D, :D],
                     preferred_element_type=f32) + biases[_B_CA_Q, :D])
        kv = (jnp.dot(e, w_ref[_R_CA_KV:_R_CA_KV + D, :2 * D],
                      preferred_element_type=f32) + biases[_B_CA_KV, :2 * D])
        kv3 = kv.reshape(B, Se, 2 * D)
        ca = attention(q.reshape(B, Sd, D), kv3[..., :D], kv3[..., D:], None)
        ca = (jnp.dot(ca, w_ref[_R_CA_O:_R_CA_O + D, :D],
                      preferred_element_type=f32) + biases[_B_CA_O, :D])
        y = layer_norm(ca + y)

        # ---- feed-forward + add & norm ----
        # TODO(synk): dropout omitted (eval-mode semantics -> identity)
        h1 = jnp.maximum(
            jnp.dot(y, w_ref[_R_FF1:_R_FF1 + D, :D_FF],
                    preferred_element_type=f32) + biases[_B_FF1, :D_FF], 0.0)
        ff = (jnp.dot(h1, w_ref[_R_FF2:_R_FF2 + D_FF, :D],
                      preferred_element_type=f32) + biases[_B_FF2, :D])
        y = layer_norm(ff + y)

        out_ref[...] = y.astype(out_ref.dtype)

    return kernel


def decoder_forward(dec, enc, params):
    B, Sd, D = dec.shape
    _, Se, _ = enc.shape
    assert D == D_MODEL
    w_slab, b_slab = _pack_params(params)

    dec2 = dec.reshape(B * Sd, D)   # fold batch into rows on the host (free)
    enc2 = enc.reshape(B * Se, D)

    def vmem():
        return pl.BlockSpec(memory_space=pltpu.MemorySpace.VMEM)

    out2 = pl.pallas_call(
        _make_decoder_kernel(B, Sd, Se),
        out_shape=jax.ShapeDtypeStruct((B * Sd, D), jnp.float32),
        in_specs=[vmem(), vmem(), vmem(), vmem()],
        out_specs=vmem(),
        compiler_params=pltpu.CompilerParams(vmem_limit_bytes=32 * 1024 * 1024),
    )(dec2, enc2, w_slab, b_slab)
    return out2.reshape(B, Sd, D)


# ---------------------------------------------------------------------------
# pure-JAX reference (mirrors torch semantics; used for the correctness check)
# ---------------------------------------------------------------------------
def _layer_norm_ref(y, gamma, beta):
    mu = jnp.mean(y, axis=-1, keepdims=True)
    var = jnp.mean((y - mu) ** 2, axis=-1, keepdims=True)
    return (y - mu) * jax.lax.rsqrt(var + LN_EPS) * gamma + beta


def _mha_ref(q_in, kv_in, in_w, in_b, out_w, out_b, causal):
    D = q_in.shape[-1]
    wq, wk, wv = in_w[:D], in_w[D:2 * D], in_w[2 * D:]
    bq, bk, bv = in_b[0, :D], in_b[0, D:2 * D], in_b[0, 2 * D:]
    q = q_in @ wq.T + bq
    k = kv_in @ wk.T + bk
    v = kv_in @ wv.T + bv
    scale = 1.0 / float(HEAD_DIM) ** 0.5
    Sq, Sk = q_in.shape[0], kv_in.shape[0]
    outs = []
    for h in range(N_HEADS):
        sl = slice(h * HEAD_DIM, (h + 1) * HEAD_DIM)
        s = (q[:, sl] @ k[:, sl].T) * scale
        if causal:
            row = jax.lax.broadcasted_iota(jnp.int32, (Sq, Sk), 0)
            col = jax.lax.broadcasted_iota(jnp.int32, (Sq, Sk), 1)
            s = jnp.where(col <= row, s, -jnp.inf)
        p = jax.nn.softmax(s, axis=-1)
        outs.append(p @ v[:, sl])
    attn = jnp.concatenate(outs, axis=-1)
    return attn @ out_w.T + out_b[0]


def _decoder_ref_single(dec, enc, params):
    (sa_w, sa_b, sa_ow, sa_ob, ca_w, ca_b, ca_ow, ca_ob,
     ln_w, ln_b, w1, b1, w2, b2) = params
    gamma, beta = ln_w[0], ln_b[0]
    sa = _mha_ref(dec, dec, sa_w, sa_b, sa_ow, sa_ob, True)
    y = _layer_norm_ref(sa + dec, gamma, beta)
    ca = _mha_ref(y, enc, ca_w, ca_b, ca_ow, ca_ob, False)
    y = _layer_norm_ref(ca + y, gamma, beta)
    h = jnp.maximum(y @ w1.T + b1[0], 0.0)
    ff = h @ w2.T + b2[0]
    return _layer_norm_ref(ff + y, gamma, beta)


if __name__ == "__main__":
    key = jax.random.PRNGKey(0)
    B, Sd, Se = 2, 8, 16
    ks = jax.random.split(key, 16)

    dec = jax.random.normal(ks[0], (B, Sd, D_MODEL), jnp.float32)
    enc = jax.random.normal(ks[1], (B, Se, D_MODEL), jnp.float32)

    s = 0.1  # deterministic small-scale init
    params = (
        jax.random.normal(ks[2], (3 * D_MODEL, D_MODEL), jnp.float32) * s,  # sa in_proj_w
        jax.random.normal(ks[3], (1, 3 * D_MODEL), jnp.float32) * s,        # sa in_proj_b
        jax.random.normal(ks[4], (D_MODEL, D_MODEL), jnp.float32) * s,      # sa out_proj_w
        jax.random.normal(ks[5], (1, D_MODEL), jnp.float32) * s,            # sa out_proj_b
        jax.random.normal(ks[6], (3 * D_MODEL, D_MODEL), jnp.float32) * s,  # ca in_proj_w
        jax.random.normal(ks[7], (1, 3 * D_MODEL), jnp.float32) * s,        # ca in_proj_b
        jax.random.normal(ks[8], (D_MODEL, D_MODEL), jnp.float32) * s,      # ca out_proj_w
        jax.random.normal(ks[9], (1, D_MODEL), jnp.float32) * s,            # ca out_proj_b
        jnp.ones((1, D_MODEL), jnp.float32),                                # layer_norm weight
        jnp.zeros((1, D_MODEL), jnp.float32),                               # layer_norm bias
        jax.random.normal(ks[10], (D_FF, D_MODEL), jnp.float32) * s,        # ff linear_1 w
        jax.random.normal(ks[11], (1, D_FF), jnp.float32) * s,              # ff linear_1 b
        jax.random.normal(ks[12], (D_MODEL, D_FF), jnp.float32) * s,        # ff linear_2 w
        jax.random.normal(ks[13], (1, D_MODEL), jnp.float32) * s,           # ff linear_2 b
    )

    out = jax.jit(decoder_forward)(dec, enc, params)
    out = jax.block_until_ready(out)

    ref = jax.vmap(_decoder_ref_single, in_axes=(0, 0, None))(dec, enc, params)
    assert out.shape == (B, Sd, D_MODEL)
    # tolerance allows for the approximate (EUP) reciprocal in the softmax denom;
    # any structural bug would produce O(0.1..1) errors.
    assert jnp.allclose(out, ref, rtol=2e-3, atol=2e-3), (
        float(jnp.max(jnp.abs(out - ref))))

    print("KERNEL_OK")
</pallas_src>

<mosaic_0001>
module attributes {stable_mosaic.version = 11 : i64} {
  func.func @kernel(%arg0: memref<16x32xf32, #tpu.memory_space<vmem>>, %arg1: memref<32x32xf32, #tpu.memory_space<vmem>>, %arg2: memref<256x128xf32, #tpu.memory_space<vmem>>, %arg3: memref<16x128xf32, #tpu.memory_space<vmem>>, %arg4: memref<16x32xf32, #tpu.memory_space<vmem>>) attributes {dimension_semantics = [], scalar_prefetch = 0 : i64, scratch_operands = 0 : i64, tpu.core_type = #tpu.core_type<tc>} {
    %c0 = arith.constant 0 : index
    %c0_0 = arith.constant 0 : index
    %0 = vector.load %arg0[%c0, %c0_0] : memref<16x32xf32, #tpu.memory_space<vmem>>, vector<16x32xf32>
    %c0_1 = arith.constant 0 : index
    %c0_2 = arith.constant 0 : index
    %1 = vector.load %arg1[%c0_1, %c0_2] : memref<32x32xf32, #tpu.memory_space<vmem>>, vector<32x32xf32>
    %c0_3 = arith.constant 0 : index
    %c0_4 = arith.constant 0 : index
    %2 = vector.load %arg3[%c0_3, %c0_4] : memref<16x128xf32, #tpu.memory_space<vmem>>, vector<16x128xf32>
    %3 = vector.extract_strided_slice %2 {offsets = [5, 0], sizes = [1, 32], strides = [1, 1]} : vector<16x128xf32> to vector<1x32xf32>
    %4 = vector.shape_cast %3 : vector<1x32xf32> to vector<32xf32>
    %5 = vector.extract_strided_slice %2 {offsets = [6, 0], sizes = [1, 32], strides = [1, 1]} : vector<16x128xf32> to vector<1x32xf32>
    %6 = vector.shape_cast %5 : vector<1x32xf32> to vector<32xf32>
    %7 = tpu.iota {dimensions = array<i32: 1>} : vector<2x8x8xi32>
    %8 = tpu.iota {dimensions = array<i32: 2>} : vector<2x8x8xi32>
    %9 = arith.cmpi sle, %8, %7 : vector<2x8x8xi32>
    %cst = arith.constant 0.000000e+00 : f32
    %cst_5 = arith.constant -1.000000e+30 : f32
    %10 = vector.broadcast %cst : f32 to vector<2x8x8xf32>
    %11 = vector.broadcast %cst_5 : f32 to vector<2x8x8xf32>
    %12 = arith.select %9, %10, %11 : vector<2x8x8xi1>, vector<2x8x8xf32>
    %c0_6 = arith.constant 0 : index
    %c0_7 = arith.constant 0 : index
    %13 = vector.load %arg2[%c0_6, %c0_7] : memref<256x128xf32, #tpu.memory_space<vmem>>, vector<32x96xf32>
    %cst_8 = arith.constant dense<0.000000e+00> : vector<16x96xf32>
    %14 = tpu.matmul %0, %13, %cst_8 {dimension_numbers = #tpu.dot_dimension_numbers<[1], [0], [0], [1], [0, 0, 1, 1], [], []>} : vector<16x32xf32>, vector<32x96xf32>, vector<16x96xf32> -> vector<16x96xf32>
    %15 = vector.extract_strided_slice %2 {offsets = [0, 0], sizes = [1, 96], strides = [1, 1]} : vector<16x128xf32> to vector<1x96xf32>
    %16 = vector.shape_cast %15 : vector<1x96xf32> to vector<96xf32>
    %17 = vector.shape_cast %16 : vector<96xf32> to vector<1x96xf32>
    %18 = vector.broadcast %17 : vector<1x96xf32> to vector<16x96xf32>
    %19 = arith.addf %14, %18 : vector<16x96xf32>
    %20 = vector.shape_cast %19 : vector<16x96xf32> to vector<2x8x96xf32>
    %21 = vector.extract_strided_slice %20 {offsets = [0, 0, 0], sizes = [2, 8, 32], strides = [1, 1, 1]} : vector<2x8x96xf32> to vector<2x8x32xf32>
    %22 = vector.extract_strided_slice %20 {offsets = [0, 0, 32], sizes = [2, 8, 32], strides = [1, 1, 1]} : vector<2x8x96xf32> to vector<2x8x32xf32>
    %23 = vector.extract_strided_slice %20 {offsets = [0, 0, 64], sizes = [2, 8, 32], strides = [1, 1, 1]} : vector<2x8x96xf32> to vector<2x8x32xf32>
    %24 = vector.extract_strided_slice %21 {offsets = [0, 0, 0], sizes = [2, 8, 8], strides = [1, 1, 1]} : vector<2x8x32xf32> to vector<2x8x8xf32>
    %25 = vector.extract_strided_slice %22 {offsets = [0, 0, 0], sizes = [2, 8, 8], strides = [1, 1, 1]} : vector<2x8x32xf32> to vector<2x8x8xf32>
    "tpu.trace_start"() <{level = 10 : i32, message = "bqd,bkd->bqk"}> : () -> ()
    %cst_9 = arith.constant dense<0.000000e+00> : vector<2x8x8xf32>
    %26 = tpu.matmul %24, %25, %cst_9 {dimension_numbers = #tpu.dot_dimension_numbers<[2], [2], [1], [1], [0, 0, 0, 1, 1, 1], [0], [0]>} : vector<2x8x8xf32>, vector<2x8x8xf32>, vector<2x8x8xf32> -> vector<2x8x8xf32>
    "tpu.trace_stop"() : () -> ()
    %cst_10 = arith.constant 0.353553385 : f32
    %27 = vector.broadcast %cst_10 : f32 to vector<2x8x8xf32>
    %28 = arith.mulf %26, %27 : vector<2x8x8xf32>
    %29 = arith.addf %28, %12 : vector<2x8x8xf32>
    %cst_11 = arith.constant dense<0xFF800000> : vector<2x8xf32>
    %30 = vector.multi_reduction <maximumf>, %29, %cst_11 [2] : vector<2x8x8xf32> to vector<2x8xf32>
    %31 = vector.shape_cast %30 : vector<2x8xf32> to vector<2x8x1xf32>
    %32 = vector.broadcast %31 : vector<2x8x1xf32> to vector<2x8x8xf32>
    %33 = arith.subf %29, %32 : vector<2x8x8xf32>
    %34 = math.exp %33 : vector<2x8x8xf32>
    %cst_12 = arith.constant dense<0.000000e+00> : vector<2x8xf32>
    %35 = vector.multi_reduction <add>, %34, %cst_12 [2] : vector<2x8x8xf32> to vector<2x8xf32>
    %36 = vector.shape_cast %35 : vector<2x8xf32> to vector<2x8x1xf32>
    %37 = tpu.reciprocal %36 {approx = true} : vector<2x8x1xf32> -> vector<2x8x1xf32>
    %38 = vector.extract_strided_slice %23 {offsets = [0, 0, 0], sizes = [2, 8, 8], strides = [1, 1, 1]} : vector<2x8x32xf32> to vector<2x8x8xf32>
    "tpu.trace_start"() <{level = 10 : i32, message = "bqk,bkd->bqd"}> : () -> ()
    %cst_13 = arith.constant dense<0.000000e+00> : vector<2x8x8xf32>
    %39 = tpu.matmul %34, %38, %cst_13 {dimension_numbers = #tpu.dot_dimension_numbers<[2], [1], [1], [2], [0, 0, 0, 1, 1, 2], [0], [0]>} : vector<2x8x8xf32>, vector<2x8x8xf32>, vector<2x8x8xf32> -> vector<2x8x8xf32>
    "tpu.trace_stop"() : () -> ()
    %40 = vector.broadcast %37 : vector<2x8x1xf32> to vector<2x8x8xf32>
    %41 = arith.mulf %39, %40 : vector<2x8x8xf32>
    %42 = vector.shape_cast %41 : vector<2x8x8xf32> to vector<16x8xf32>
    %43 = vector.extract_strided_slice %21 {offsets = [0, 0, 8], sizes = [2, 8, 8], strides = [1, 1, 1]} : vector<2x8x32xf32> to vector<2x8x8xf32>
    %44 = vector.extract_strided_slice %22 {offsets = [0, 0, 8], sizes = [2, 8, 8], strides = [1, 1, 1]} : vector<2x8x32xf32> to vector<2x8x8xf32>
    "tpu.trace_start"() <{level = 10 : i32, message = "bqd,bkd->bqk"}> : () -> ()
    %cst_14 = arith.constant dense<0.000000e+00> : vector<2x8x8xf32>
    %45 = tpu.matmul %43, %44, %cst_14 {dimension_numbers = #tpu.dot_dimension_numbers<[2], [2], [1], [1], [0, 0, 0, 1, 1, 1], [0], [0]>} : vector<2x8x8xf32>, vector<2x8x8xf32>, vector<2x8x8xf32> -> vector<2x8x8xf32>
    "tpu.trace_stop"() : () -> ()
    %cst_15 = arith.constant 0.353553385 : f32
    %46 = vector.broadcast %cst_15 : f32 to vector<2x8x8xf32>
    %47 = arith.mulf %45, %46 : vector<2x8x8xf32>
    %48 = arith.addf %47, %12 : vector<2x8x8xf32>
    %cst_16 = arith.constant dense<0xFF800000> : vector<2x8xf32>
    %49 = vector.multi_reduction <maximumf>, %48, %cst_16 [2] : vector<2x8x8xf32> to vector<2x8xf32>
    %50 = vector.shape_cast %49 : vector<2x8xf32> to vector<2x8x1xf32>
    %51 = vector.broadcast %50 : vector<2x8x1xf32> to vector<2x8x8xf32>
    %52 = arith.subf %48, %51 : vector<2x8x8xf32>
    %53 = math.exp %52 : vector<2x8x8xf32>
    %cst_17 = arith.constant dense<0.000000e+00> : vector<2x8xf32>
    %54 = vector.multi_reduction <add>, %53, %cst_17 [2] : vector<2x8x8xf32> to vector<2x8xf32>
    %55 = vector.shape_cast %54 : vector<2x8xf32> to vector<2x8x1xf32>
    %56 = tpu.reciprocal %55 {approx = true} : vector<2x8x1xf32> -> vector<2x8x1xf32>
    %57 = vector.extract_strided_slice %23 {offsets = [0, 0, 8], sizes = [2, 8, 8], strides = [1, 1, 1]} : vector<2x8x32xf32> to vector<2x8x8xf32>
    "tpu.trace_start"() <{level = 10 : i32, message = "bqk,bkd->bqd"}> : () -> ()
    %cst_18 = arith.constant dense<0.000000e+00> : vector<2x8x8xf32>
    %58 = tpu.matmul %53, %57, %cst_18 {dimension_numbers = #tpu.dot_dimension_numbers<[2], [1], [1], [2], [0, 0, 0, 1, 1, 2], [0], [0]>} : vector<2x8x8xf32>, vector<2x8x8xf32>, vector<2x8x8xf32> -> vector<2x8x8xf32>
    "tpu.trace_stop"() : () -> ()
    %59 = vector.broadcast %56 : vector<2x8x1xf32> to vector<2x8x8xf32>
    %60 = arith.mulf %58, %59 : vector<2x8x8xf32>
    %61 = vector.shape_cast %60 : vector<2x8x8xf32> to vector<16x8xf32>
    %62 = vector.extract_strided_slice %21 {offsets = [0, 0, 16], sizes = [2, 8, 8], strides = [1, 1, 1]} : vector<2x8x32xf32> to vector<2x8x8xf32>
    %63 = vector.extract_strided_slice %22 {offsets = [0, 0, 16], sizes = [2, 8, 8], strides = [1, 1, 1]} : vector<2x8x32xf32> to vector<2x8x8xf32>
    "tpu.trace_start"() <{level = 10 : i32, message = "bqd,bkd->bqk"}> : () -> ()
    %cst_19 = arith.constant dense<0.000000e+00> : vector<2x8x8xf32>
    %64 = tpu.matmul %62, %63, %cst_19 {dimension_numbers = #tpu.dot_dimension_numbers<[2], [2], [1], [1], [0, 0, 0, 1, 1, 1], [0], [0]>} : vector<2x8x8xf32>, vector<2x8x8xf32>, vector<2x8x8xf32> -> vector<2x8x8xf32>
    "tpu.trace_stop"() : () -> ()
    %cst_20 = arith.constant 0.353553385 : f32
    %65 = vector.broadcast %cst_20 : f32 to vector<2x8x8xf32>
    %66 = arith.mulf %64, %65 : vector<2x8x8xf32>
    %67 = arith.addf %66, %12 : vector<2x8x8xf32>
    %cst_21 = arith.constant dense<0xFF800000> : vector<2x8xf32>
    %68 = vector.multi_reduction <maximumf>, %67, %cst_21 [2] : vector<2x8x8xf32> to vector<2x8xf32>
    %69 = vector.shape_cast %68 : vector<2x8xf32> to vector<2x8x1xf32>
    %70 = vector.broadcast %69 : vector<2x8x1xf32> to vector<2x8x8xf32>
    %71 = arith.subf %67, %70 : vector<2x8x8xf32>
    %72 = math.exp %71 : vector<2x8x8xf32>
    %cst_22 = arith.constant dense<0.000000e+00> : vector<2x8xf32>
    %73 = vector.multi_reduction <add>, %72, %cst_22 [2] : vector<2x8x8xf32> to vector<2x8xf32>
    %74 = vector.shape_cast %73 : vector<2x8xf32> to vector<2x8x1xf32>
    %75 = tpu.reciprocal %74 {approx = true} : vector<2x8x1xf32> -> vector<2x8x1xf32>
    %76 = vector.extract_strided_slice %23 {offsets = [0, 0, 16], sizes = [2, 8, 8], strides = [1, 1, 1]} : vector<2x8x32xf32> to vector<2x8x8xf32>
    "tpu.trace_start"() <{level = 10 : i32, message = "bqk,bkd->bqd"}> : () -> ()
    %cst_23 = arith.constant dense<0.000000e+00> : vector<2x8x8xf32>
    %77 = tpu.matmul %72, %76, %cst_23 {dimension_numbers = #tpu.dot_dimension_numbers<[2], [1], [1], [2], [0, 0, 0, 1, 1, 2], [0], [0]>} : vector<2x8x8xf32>, vector<2x8x8xf32>, vector<2x8x8xf32> -> vector<2x8x8xf32>
    "tpu.trace_stop"() : () -> ()
    %78 = vector.broadcast %75 : vector<2x8x1xf32> to vector<2x8x8xf32>
    %79 = arith.mulf %77, %78 : vector<2x8x8xf32>
    %80 = vector.shape_cast %79 : vector<2x8x8xf32> to vector<16x8xf32>
    %81 = vector.extract_strided_slice %21 {offsets = [0, 0, 24], sizes = [2, 8, 8], strides = [1, 1, 1]} : vector<2x8x32xf32> to vector<2x8x8xf32>
    %82 = vector.extract_strided_slice %22 {offsets = [0, 0, 24], sizes = [2, 8, 8], strides = [1, 1, 1]} : vector<2x8x32xf32> to vector<2x8x8xf32>
    "tpu.trace_start"() <{level = 10 : i32, message = "bqd,bkd->bqk"}> : () -> ()
    %cst_24 = arith.constant dense<0.000000e+00> : vector<2x8x8xf32>
    %83 = tpu.matmul %81, %82, %cst_24 {dimension_numbers = #tpu.dot_dimension_numbers<[2], [2], [1], [1], [0, 0, 0, 1, 1, 1], [0], [0]>} : vector<2x8x8xf32>, vector<2x8x8xf32>, vector<2x8x8xf32> -> vector<2x8x8xf32>
    "tpu.trace_stop"() : () -> ()
    %cst_25 = arith.constant 0.353553385 : f32
    %84 = vector.broadcast %cst_25 : f32 to vector<2x8x8xf32>
    %85 = arith.mulf %83, %84 : vector<2x8x8xf32>
    %86 = arith.addf %85, %12 : vector<2x8x8xf32>
    %cst_26 = arith.constant dense<0xFF800000> : vector<2x8xf32>
    %87 = vector.multi_reduction <maximumf>, %86, %cst_26 [2] : vector<2x8x8xf32> to vector<2x8xf32>
    %88 = vector.shape_cast %87 : vector<2x8xf32> to vector<2x8x1xf32>
    %89 = vector.broadcast %88 : vector<2x8x1xf32> to vector<2x8x8xf32>
    %90 = arith.subf %86, %89 : vector<2x8x8xf32>
    %91 = math.exp %90 : vector<2x8x8xf32>
    %cst_27 = arith.constant dense<0.000000e+00> : vector<2x8xf32>
    %92 = vector.multi_reduction <add>, %91, %cst_27 [2] : vector<2x8x8xf32> to vector<2x8xf32>
    %93 = vector.shape_cast %92 : vector<2x8xf32> to vector<2x8x1xf32>
    %94 = tpu.reciprocal %93 {approx = true} : vector<2x8x1xf32> -> vector<2x8x1xf32>
    %95 = vector.extract_strided_slice %23 {offsets = [0, 0, 24], sizes = [2, 8, 8], strides = [1, 1, 1]} : vector<2x8x32xf32> to vector<2x8x8xf32>
    "tpu.trace_start"() <{level = 10 : i32, message = "bqk,bkd->bqd"}> : () -> ()
    %cst_28 = arith.constant dense<0.000000e+00> : vector<2x8x8xf32>
    %96 = tpu.matmul %91, %95, %cst_28 {dimension_numbers = #tpu.dot_dimension_numbers<[2], [1], [1], [2], [0, 0, 0, 1, 1, 2], [0], [0]>} : vector<2x8x8xf32>, vector<2x8x8xf32>, vector<2x8x8xf32> -> vector<2x8x8xf32>
    "tpu.trace_stop"() : () -> ()
    %97 = vector.broadcast %94 : vector<2x8x1xf32> to vector<2x8x8xf32>
    %98 = arith.mulf %96, %97 : vector<2x8x8xf32>
    %99 = vector.shape_cast %98 : vector<2x8x8xf32> to vector<16x8xf32>
    %100 = tpu.concatenate %42, %61, %80, %99 in 1 : vector<16x8xf32>, vector<16x8xf32>, vector<16x8xf32>, vector<16x8xf32> -> vector<16x32xf32>
    %c96 = arith.constant 96 : index
    %c0_29 = arith.constant 0 : index
    %101 = vector.load %arg2[%c96, %c0_29] : memref<256x128xf32, #tpu.memory_space<vmem>>, vector<32x32xf32>
    %cst_30 = arith.constant dense<0.000000e+00> : vector<16x32xf32>
    %102 = tpu.matmul %100, %101, %cst_30 {dimension_numbers = #tpu.dot_dimension_numbers<[1], [0], [0], [1], [0, 0, 1, 1], [], []>} : vector<16x32xf32>, vector<32x32xf32>, vector<16x32xf32> -> vector<16x32xf32>
    %103 = vector.extract_strided_slice %2 {offsets = [3, 0], sizes = [1, 32], strides = [1, 1]} : vector<16x128xf32> to vector<1x32xf32>
    %104 = vector.shape_cast %103 : vector<1x32xf32> to vector<32xf32>
    %105 = vector.shape_cast %104 : vector<32xf32> to vector<1x32xf32>
    %106 = vector.broadcast %105 : vector<1x32xf32> to vector<16x32xf32>
    %107 = arith.addf %102, %106 : vector<16x32xf32>
    %108 = arith.addf %107, %0 : vector<16x32xf32>
    %cst_31 = arith.constant dense<0.000000e+00> : vector<16xf32>
    %109 = vector.multi_reduction <add>, %108, %cst_31 [1] : vector<16x32xf32> to vector<16xf32>
    %110 = vector.shape_cast %109 : vector<16xf32> to vector<16x1xf32>
    %cst_32 = arith.constant 3.200000e+01 : f32
    %111 = vector.broadcast %cst_32 : f32 to vector<16x1xf32>
    %112 = arith.divf %110, %111 : vector<16x1xf32>
    %113 = vector.broadcast %112 : vector<16x1xf32> to vector<16x32xf32>
    %114 = arith.subf %108, %113 : vector<16x32xf32>
    %115 = arith.mulf %114, %114 : vector<16x32xf32>
    %cst_33 = arith.constant dense<0.000000e+00> : vector<16xf32>
    %116 = vector.multi_reduction <add>, %115, %cst_33 [1] : vector<16x32xf32> to vector<16xf32>
    %117 = vector.shape_cast %116 : vector<16xf32> to vector<16x1xf32>
    %cst_34 = arith.constant 3.200000e+01 : f32
    %118 = vector.broadcast %cst_34 : f32 to vector<16x1xf32>
    %119 = arith.divf %117, %118 : vector<16x1xf32>
    %120 = vector.broadcast %112 : vector<16x1xf32> to vector<16x32xf32>
    %121 = arith.subf %108, %120 : vector<16x32xf32>
    %cst_35 = arith.constant 9.99999974E-6 : f32
    %122 = vector.broadcast %cst_35 : f32 to vector<16x1xf32>
    %123 = arith.addf %119, %122 : vector<16x1xf32>
    %124 = math.rsqrt %123 : vector<16x1xf32>
    %125 = vector.broadcast %124 : vector<16x1xf32> to vector<16x32xf32>
    %126 = arith.mulf %121, %125 : vector<16x32xf32>
    %127 = vector.shape_cast %4 : vector<32xf32> to vector<1x32xf32>
    %128 = vector.broadcast %127 : vector<1x32xf32> to vector<16x32xf32>
    %129 = arith.mulf %126, %128 : vector<16x32xf32>
    %130 = vector.shape_cast %6 : vector<32xf32> to vector<1x32xf32>
    %131 = vector.broadcast %130 : vector<1x32xf32> to vector<16x32xf32>
    %132 = arith.addf %129, %131 : vector<16x32xf32>
    %c32 = arith.constant 32 : index
    %c0_36 = arith.constant 0 : index
    %133 = vector.load %arg2[%c32, %c0_36] : memref<256x128xf32, #tpu.memory_space<vmem>>, vector<32x32xf32>
    %cst_37 = arith.constant dense<0.000000e+00> : vector<16x32xf32>
    %134 = tpu.matmul %132, %133, %cst_37 {dimension_numbers = #tpu.dot_dimension_numbers<[1], [0], [0], [1], [0, 0, 1, 1], [], []>} : vector<16x32xf32>, vector<32x32xf32>, vector<16x32xf32> -> vector<16x32xf32>
    %135 = vector.extract_strided_slice %2 {offsets = [1, 0], sizes = [1, 32], strides = [1, 1]} : vector<16x128xf32> to vector<1x32xf32>
    %136 = vector.shape_cast %135 : vector<1x32xf32> to vector<32xf32>
    %137 = vector.shape_cast %136 : vector<32xf32> to vector<1x32xf32>
    %138 = vector.broadcast %137 : vector<1x32xf32> to vector<16x32xf32>
    %139 = arith.addf %134, %138 : vector<16x32xf32>
    %c64 = arith.constant 64 : index
    %c0_38 = arith.constant 0 : index
    %140 = vector.load %arg2[%c64, %c0_38] : memref<256x128xf32, #tpu.memory_space<vmem>>, vector<32x64xf32>
    %cst_39 = arith.constant dense<0.000000e+00> : vector<32x64xf32>
    %141 = tpu.matmul %1, %140, %cst_39 {dimension_numbers = #tpu.dot_dimension_numbers<[1], [0], [0], [1], [0, 0, 1, 1], [], []>} : vector<32x32xf32>, vector<32x64xf32>, vector<32x64xf32> -> vector<32x64xf32>
    %142 = vector.extract_strided_slice %2 {offsets = [2, 0], sizes = [1, 64], strides = [1, 1]} : vector<16x128xf32> to vector<1x64xf32>
    %143 = vector.shape_cast %142 : vector<1x64xf32> to vector<64xf32>
    %144 = vector.shape_cast %143 : vector<64xf32> to vector<1x64xf32>
    %145 = vector.broadcast %144 : vector<1x64xf32> to vector<32x64xf32>
    %146 = arith.addf %141, %145 : vector<32x64xf32>
    %147 = vector.shape_cast %146 : vector<32x64xf32> to vector<2x16x64xf32>
    %148 = vector.shape_cast %139 : vector<16x32xf32> to vector<2x8x32xf32>
    %149 = vector.extract_strided_slice %147 {offsets = [0, 0, 0], sizes = [2, 16, 32], strides = [1, 1, 1]} : vector<2x16x64xf32> to vector<2x16x32xf32>
    %150 = vector.extract_strided_slice %147 {offsets = [0, 0, 32], sizes = [2, 16, 32], strides = [1, 1, 1]} : vector<2x16x64xf32> to vector<2x16x32xf32>
    %151 = vector.extract_strided_slice %148 {offsets = [0, 0, 0], sizes = [2, 8, 8], strides = [1, 1, 1]} : vector<2x8x32xf32> to vector<2x8x8xf32>
    %152 = vector.extract_strided_slice %149 {offsets = [0, 0, 0], sizes = [2, 16, 8], strides = [1, 1, 1]} : vector<2x16x32xf32> to vector<2x16x8xf32>
    "tpu.trace_start"() <{level = 10 : i32, message = "bqd,bkd->bqk"}> : () -> ()
    %cst_40 = arith.constant dense<0.000000e+00> : vector<2x8x16xf32>
    %153 = tpu.matmul %151, %152, %cst_40 {dimension_numbers = #tpu.dot_dimension_numbers<[2], [2], [1], [1], [0, 0, 0, 1, 1, 1], [0], [0]>} : vector<2x8x8xf32>, vector<2x16x8xf32>, vector<2x8x16xf32> -> vector<2x8x16xf32>
    "tpu.trace_stop"() : () -> ()
    %cst_41 = arith.constant 0.353553385 : f32
    %154 = vector.broadcast %cst_41 : f32 to vector<2x8x16xf32>
    %155 = arith.mulf %153, %154 : vector<2x8x16xf32>
    %cst_42 = arith.constant dense<0xFF800000> : vector<2x8xf32>
    %156 = vector.multi_reduction <maximumf>, %155, %cst_42 [2] : vector<2x8x16xf32> to vector<2x8xf32>
    %157 = vector.shape_cast %156 : vector<2x8xf32> to vector<2x8x1xf32>
    %158 = vector.broadcast %157 : vector<2x8x1xf32> to vector<2x8x16xf32>
    %159 = arith.subf %155, %158 : vector<2x8x16xf32>
    %160 = math.exp %159 : vector<2x8x16xf32>
    %cst_43 = arith.constant dense<0.000000e+00> : vector<2x8xf32>
    %161 = vector.multi_reduction <add>, %160, %cst_43 [2] : vector<2x8x16xf32> to vector<2x8xf32>
    %162 = vector.shape_cast %161 : vector<2x8xf32> to vector<2x8x1xf32>
    %163 = tpu.reciprocal %162 {approx = true} : vector<2x8x1xf32> -> vector<2x8x1xf32>
    %164 = vector.extract_strided_slice %150 {offsets = [0, 0, 0], sizes = [2, 16, 8], strides = [1, 1, 1]} : vector<2x16x32xf32> to vector<2x16x8xf32>
    "tpu.trace_start"() <{level = 10 : i32, message = "bqk,bkd->bqd"}> : () -> ()
    %cst_44 = arith.constant dense<0.000000e+00> : vector<2x8x8xf32>
    %165 = tpu.matmul %160, %164, %cst_44 {dimension_numbers = #tpu.dot_dimension_numbers<[2], [1], [1], [2], [0, 0, 0, 1, 1, 2], [0], [0]>} : vector<2x8x16xf32>, vector<2x16x8xf32>, vector<2x8x8xf32> -> vector<2x8x8xf32>
    "tpu.trace_stop"() : () -> ()
    %166 = vector.broadcast %163 : vector<2x8x1xf32> to vector<2x8x8xf32>
    %167 = arith.mulf %165, %166 : vector<2x8x8xf32>
    %168 = vector.shape_cast %167 : vector<2x8x8xf32> to vector<16x8xf32>
    %169 = vector.extract_strided_slice %148 {offsets = [0, 0, 8], sizes = [2, 8, 8], strides = [1, 1, 1]} : vector<2x8x32xf32> to vector<2x8x8xf32>
    %170 = vector.extract_strided_slice %149 {offsets = [0, 0, 8], sizes = [2, 16, 8], strides = [1, 1, 1]} : vector<2x16x32xf32> to vector<2x16x8xf32>
    "tpu.trace_start"() <{level = 10 : i32, message = "bqd,bkd->bqk"}> : () -> ()
    %cst_45 = arith.constant dense<0.000000e+00> : vector<2x8x16xf32>
    %171 = tpu.matmul %169, %170, %cst_45 {dimension_numbers = #tpu.dot_dimension_numbers<[2], [2], [1], [1], [0, 0, 0, 1, 1, 1], [0], [0]>} : vector<2x8x8xf32>, vector<2x16x8xf32>, vector<2x8x16xf32> -> vector<2x8x16xf32>
    "tpu.trace_stop"() : () -> ()
    %cst_46 = arith.constant 0.353553385 : f32
    %172 = vector.broadcast %cst_46 : f32 to vector<2x8x16xf32>
    %173 = arith.mulf %171, %172 : vector<2x8x16xf32>
    %cst_47 = arith.constant dense<0xFF800000> : vector<2x8xf32>
    %174 = vector.multi_reduction <maximumf>, %173, %cst_47 [2] : vector<2x8x16xf32> to vector<2x8xf32>
    %175 = vector.shape_cast %174 : vector<2x8xf32> to vector<2x8x1xf32>
    %176 = vector.broadcast %175 : vector<2x8x1xf32> to vector<2x8x16xf32>
    %177 = arith.subf %173, %176 : vector<2x8x16xf32>
    %178 = math.exp %177 : vector<2x8x16xf32>
    %cst_48 = arith.constant dense<0.000000e+00> : vector<2x8xf32>
    %179 = vector.multi_reduction <add>, %178, %cst_48 [2] : vector<2x8x16xf32> to vector<2x8xf32>
    %180 = vector.shape_cast %179 : vector<2x8xf32> to vector<2x8x1xf32>
    %181 = tpu.reciprocal %180 {approx = true} : vector<2x8x1xf32> -> vector<2x8x1xf32>
    %182 = vector.extract_strided_slice %150 {offsets = [0, 0, 8], sizes = [2, 16, 8], strides = [1, 1, 1]} : vector<2x16x32xf32> to vector<2x16x8xf32>
    "tpu.trace_start"() <{level = 10 : i32, message = "bqk,bkd->bqd"}> : () -> ()
    %cst_49 = arith.constant dense<0.000000e+00> : vector<2x8x8xf32>
    %183 = tpu.matmul %178, %182, %cst_49 {dimension_numbers = #tpu.dot_dimension_numbers<[2], [1], [1], [2], [0, 0, 0, 1, 1, 2], [0], [0]>} : vector<2x8x16xf32>, vector<2x16x8xf32>, vector<2x8x8xf32> -> vector<2x8x8xf32>
    "tpu.trace_stop"() : () -> ()
    %184 = vector.broadcast %181 : vector<2x8x1xf32> to vector<2x8x8xf32>
    %185 = arith.mulf %183, %184 : vector<2x8x8xf32>
    %186 = vector.shape_cast %185 : vector<2x8x8xf32> to vector<16x8xf32>
    %187 = vector.extract_strided_slice %148 {offsets = [0, 0, 16], sizes = [2, 8, 8], strides = [1, 1, 1]} : vector<2x8x32xf32> to vector<2x8x8xf32>
    %188 = vector.extract_strided_slice %149 {offsets = [0, 0, 16], sizes = [2, 16, 8], strides = [1, 1, 1]} : vector<2x16x32xf32> to vector<2x16x8xf32>
    "tpu.trace_start"() <{level = 10 : i32, message = "bqd,bkd->bqk"}> : () -> ()
    %cst_50 = arith.constant dense<0.000000e+00> : vector<2x8x16xf32>
    %189 = tpu.matmul %187, %188, %cst_50 {dimension_numbers = #tpu.dot_dimension_numbers<[2], [2], [1], [1], [0, 0, 0, 1, 1, 1], [0], [0]>} : vector<2x8x8xf32>, vector<2x16x8xf32>, vector<2x8x16xf32> -> vector<2x8x16xf32>
    "tpu.trace_stop"() : () -> ()
    %cst_51 = arith.constant 0.353553385 : f32
    %190 = vector.broadcast %cst_51 : f32 to vector<2x8x16xf32>
    %191 = arith.mulf %189, %190 : vector<2x8x16xf32>
    %cst_52 = arith.constant dense<0xFF800000> : vector<2x8xf32>
    %192 = vector.multi_reduction <maximumf>, %191, %cst_52 [2] : vector<2x8x16xf32> to vector<2x8xf32>
    %193 = vector.shape_cast %192 : vector<2x8xf32> to vector<2x8x1xf32>
    %194 = vector.broadcast %193 : vector<2x8x1xf32> to vector<2x8x16xf32>
    %195 = arith.subf %191, %194 : vector<2x8x16xf32>
    %196 = math.exp %195 : vector<2x8x16xf32>
    %cst_53 = arith.constant dense<0.000000e+00> : vector<2x8xf32>
    %197 = vector.multi_reduction <add>, %196, %cst_53 [2] : vector<2x8x16xf32> to vector<2x8xf32>
    %198 = vector.shape_cast %197 : vector<2x8xf32> to vector<2x8x1xf32>
    %199 = tpu.reciprocal %198 {approx = true} : vector<2x8x1xf32> -> vector<2x8x1xf32>
    %200 = vector.extract_strided_slice %150 {offsets = [0, 0, 16], sizes = [2, 16, 8], strides = [1, 1, 1]} : vector<2x16x32xf32> to vector<2x16x8xf32>
    "tpu.trace_start"() <{level = 10 : i32, message = "bqk,bkd->bqd"}> : () -> ()
    %cst_54 = arith.constant dense<0.000000e+00> : vector<2x8x8xf32>
    %201 = tpu.matmul %196, %200, %cst_54 {dimension_numbers = #tpu.dot_dimension_numbers<[2], [1], [1], [2], [0, 0, 0, 1, 1, 2], [0], [0]>} : vector<2x8x16xf32>, vector<2x16x8xf32>, vector<2x8x8xf32> -> vector<2x8x8xf32>
    "tpu.trace_stop"() : () -> ()
    %202 = vector.broadcast %199 : vector<2x8x1xf32> to vector<2x8x8xf32>
    %203 = arith.mulf %201, %202 : vector<2x8x8xf32>
    %204 = vector.shape_cast %203 : vector<2x8x8xf32> to vector<16x8xf32>
    %205 = vector.extract_strided_slice %148 {offsets = [0, 0, 24], sizes = [2, 8, 8], strides = [1, 1, 1]} : vector<2x8x32xf32> to vector<2x8x8xf32>
    %206 = vector.extract_strided_slice %149 {offsets = [0, 0, 24], sizes = [2, 16, 8], strides = [1, 1, 1]} : vector<2x16x32xf32> to vector<2x16x8xf32>
    "tpu.trace_start"() <{level = 10 : i32, message = "bqd,bkd->bqk"}> : () -> ()
    %cst_55 = arith.constant dense<0.000000e+00> : vector<2x8x16xf32>
    %207 = tpu.matmul %205, %206, %cst_55 {dimension_numbers = #tpu.dot_dimension_numbers<[2], [2], [1], [1], [0, 0, 0, 1, 1, 1], [0], [0]>} : vector<2x8x8xf32>, vector<2x16x8xf32>, vector<2x8x16xf32> -> vector<2x8x16xf32>
    "tpu.trace_stop"() : () -> ()
    %cst_56 = arith.constant 0.353553385 : f32
    %208 = vector.broadcast %cst_56 : f32 to vector<2x8x16xf32>
    %209 = arith.mulf %207, %208 : vector<2x8x16xf32>
    %cst_57 = arith.constant dense<0xFF800000> : vector<2x8xf32>
    %210 = vector.multi_reduction <maximumf>, %209, %cst_57 [2] : vector<2x8x16xf32> to vector<2x8xf32>
    %211 = vector.shape_cast %210 : vector<2x8xf32> to vector<2x8x1xf32>
    %212 = vector.broadcast %211 : vector<2x8x1xf32> to vector<2x8x16xf32>
    %213 = arith.subf %209, %212 : vector<2x8x16xf32>
    %214 = math.exp %213 : vector<2x8x16xf32>
    %cst_58 = arith.constant dense<0.000000e+00> : vector<2x8xf32>
    %215 = vector.multi_reduction <add>, %214, %cst_58 [2] : vector<2x8x16xf32> to vector<2x8xf32>
    %216 = vector.shape_cast %215 : vector<2x8xf32> to vector<2x8x1xf32>
    %217 = tpu.reciprocal %216 {approx = true} : vector<2x8x1xf32> -> vector<2x8x1xf32>
    %218 = vector.extract_strided_slice %150 {offsets = [0, 0, 24], sizes = [2, 16, 8], strides = [1, 1, 1]} : vector<2x16x32xf32> to vector<2x16x8xf32>
    "tpu.trace_start"() <{level = 10 : i32, message = "bqk,bkd->bqd"}> : () -> ()
    %cst_59 = arith.constant dense<0.000000e+00> : vector<2x8x8xf32>
    %219 = tpu.matmul %214, %218, %cst_59 {dimension_numbers = #tpu.dot_dimension_numbers<[2], [1], [1], [2], [0, 0, 0, 1, 1, 2], [0], [0]>} : vector<2x8x16xf32>, vector<2x16x8xf32>, vector<2x8x8xf32> -> vector<2x8x8xf32>
    "tpu.trace_stop"() : () -> ()
    %220 = vector.broadcast %217 : vector<2x8x1xf32> to vector<2x8x8xf32>
    %221 = arith.mulf %219, %220 : vector<2x8x8xf32>
    %222 = vector.shape_cast %221 : vector<2x8x8xf32> to vector<16x8xf32>
    %223 = tpu.concatenate %168, %186, %204, %222 in 1 : vector<16x8xf32>, vector<16x8xf32>, vector<16x8xf32>, vector<16x8xf32> -> vector<16x32xf32>
    %c128 = arith.constant 128 : index
    %c0_60 = arith.constant 0 : index
    %224 = vector.load %arg2[%c128, %c0_60] : memref<256x128xf32, #tpu.memory_space<vmem>>, vector<32x32xf32>
    %cst_61 = arith.constant dense<0.000000e+00> : vector<16x32xf32>
    %225 = tpu.matmul %223, %224, %cst_61 {dimension_numbers = #tpu.dot_dimension_numbers<[1], [0], [0], [1], [0, 0, 1, 1], [], []>} : vector<16x32xf32>, vector<32x32xf32>, vector<16x32xf32> -> vector<16x32xf32>
    %226 = vector.extract_strided_slice %2 {offsets = [4, 0], sizes = [1, 32], strides = [1, 1]} : vector<16x128xf32> to vector<1x32xf32>
    %227 = vector.shape_cast %226 : vector<1x32xf32> to vector<32xf32>
    %228 = vector.shape_cast %227 : vector<32xf32> to vector<1x32xf32>
    %229 = vector.broadcast %228 : vector<1x32xf32> to vector<16x32xf32>
    %230 = arith.addf %225, %229 : vector<16x32xf32>
    %231 = arith.addf %230, %132 : vector<16x32xf32>
    %cst_62 = arith.constant dense<0.000000e+00> : vector<16xf32>
    %232 = vector.multi_reduction <add>, %231, %cst_62 [1] : vector<16x32xf32> to vector<16xf32>
    %233 = vector.shape_cast %232 : vector<16xf32> to vector<16x1xf32>
    %cst_63 = arith.constant 3.200000e+01 : f32
    %234 = vector.broadcast %cst_63 : f32 to vector<16x1xf32>
    %235 = arith.divf %233, %234 : vector<16x1xf32>
    %236 = vector.broadcast %235 : vector<16x1xf32> to vector<16x32xf32>
    %237 = arith.subf %231, %236 : vector<16x32xf32>
    %238 = arith.mulf %237, %237 : vector<16x32xf32>
    %cst_64 = arith.constant dense<0.000000e+00> : vector<16xf32>
    %239 = vector.multi_reduction <add>, %238, %cst_64 [1] : vector<16x32xf32> to vector<16xf32>
    %240 = vector.shape_cast %239 : vector<16xf32> to vector<16x1xf32>
    %cst_65 = arith.constant 3.200000e+01 : f32
    %241 = vector.broadcast %cst_65 : f32 to vector<16x1xf32>
    %242 = arith.divf %240, %241 : vector<16x1xf32>
    %243 = vector.broadcast %235 : vector<16x1xf32> to vector<16x32xf32>
    %244 = arith.subf %231, %243 : vector<16x32xf32>
    %cst_66 = arith.constant 9.99999974E-6 : f32
    %245 = vector.broadcast %cst_66 : f32 to vector<16x1xf32>
    %246 = arith.addf %242, %245 : vector<16x1xf32>
    %247 = math.rsqrt %246 : vector<16x1xf32>
    %248 = vector.broadcast %247 : vector<16x1xf32> to vector<16x32xf32>
    %249 = arith.mulf %244, %248 : vector<16x32xf32>
    %250 = vector.shape_cast %4 : vector<32xf32> to vector<1x32xf32>
    %251 = vector.broadcast %250 : vector<1x32xf32> to vector<16x32xf32>
    %252 = arith.mulf %249, %251 : vector<16x32xf32>
    %253 = vector.shape_cast %6 : vector<32xf32> to vector<1x32xf32>
    %254 = vector.broadcast %253 : vector<1x32xf32> to vector<16x32xf32>
    %255 = arith.addf %252, %254 : vector<16x32xf32>
    %c160 = arith.constant 160 : index
    %c0_67 = arith.constant 0 : index
    %256 = vector.load %arg2[%c160, %c0_67] : memref<256x128xf32, #tpu.memory_space<vmem>>, vector<32x64xf32>
    %cst_68 = arith.constant dense<0.000000e+00> : vector<16x64xf32>
    %257 = tpu.matmul %255, %256, %cst_68 {dimension_numbers = #tpu.dot_dimension_numbers<[1], [0], [0], [1], [0, 0, 1, 1], [], []>} : vector<16x32xf32>, vector<32x64xf32>, vector<16x64xf32> -> vector<16x64xf32>
    %258 = vector.extract_strided_slice %2 {offsets = [7, 0], sizes = [1, 64], strides = [1, 1]} : vector<16x128xf32> to vector<1x64xf32>
    %259 = vector.shape_cast %258 : vector<1x64xf32> to vector<64xf32>
    %260 = vector.shape_cast %259 : vector<64xf32> to vector<1x64xf32>
    %261 = vector.broadcast %260 : vector<1x64xf32> to vector<16x64xf32>
    %262 = arith.addf %257, %261 : vector<16x64xf32>
    %cst_69 = arith.constant 0.000000e+00 : f32
    %263 = vector.broadcast %cst_69 : f32 to vector<16x64xf32>
    %264 = arith.maximumf %262, %263 : vector<16x64xf32>
    %c192 = arith.constant 192 : index
    %c0_70 = arith.constant 0 : index
    %265 = vector.load %arg2[%c192, %c0_70] : memref<256x128xf32, #tpu.memory_space<vmem>>, vector<64x32xf32>
    %cst_71 = arith.constant dense<0.000000e+00> : vector<16x32xf32>
    %266 = tpu.matmul %264, %265, %cst_71 {dimension_numbers = #tpu.dot_dimension_numbers<[1], [0], [0], [1], [0, 0, 1, 1], [], []>} : vector<16x64xf32>, vector<64x32xf32>, vector<16x32xf32> -> vector<16x32xf32>
    %267 = vector.extract_strided_slice %2 {offsets = [8, 0], sizes = [1, 32], strides = [1, 1]} : vector<16x128xf32> to vector<1x32xf32>
    %268 = vector.shape_cast %267 : vector<1x32xf32> to vector<32xf32>
    %269 = vector.shape_cast %268 : vector<32xf32> to vector<1x32xf32>
    %270 = vector.broadcast %269 : vector<1x32xf32> to vector<16x32xf32>
    %271 = arith.addf %266, %270 : vector<16x32xf32>
    %272 = arith.addf %271, %255 : vector<16x32xf32>
    %cst_72 = arith.constant dense<0.000000e+00> : vector<16xf32>
    %273 = vector.multi_reduction <add>, %272, %cst_72 [1] : vector<16x32xf32> to vector<16xf32>
    %274 = vector.shape_cast %273 : vector<16xf32> to vector<16x1xf32>
    %cst_73 = arith.constant 3.200000e+01 : f32
    %275 = vector.broadcast %cst_73 : f32 to vector<16x1xf32>
    %276 = arith.divf %274, %275 : vector<16x1xf32>
    %277 = vector.broadcast %276 : vector<16x1xf32> to vector<16x32xf32>
    %278 = arith.subf %272, %277 : vector<16x32xf32>
    %279 = arith.mulf %278, %278 : vector<16x32xf32>
    %cst_74 = arith.constant dense<0.000000e+00> : vector<16xf32>
    %280 = vector.multi_reduction <add>, %279, %cst_74 [1] : vector<16x32xf32> to vector<16xf32>
    %281 = vector.shape_cast %280 : vector<16xf32> to vector<16x1xf32>
    %cst_75 = arith.constant 3.200000e+01 : f32
    %282 = vector.broadcast %cst_75 : f32 to vector<16x1xf32>
    %283 = arith.divf %281, %282 : vector<16x1xf32>
    %284 = vector.broadcast %276 : vector<16x1xf32> to vector<16x32xf32>
    %285 = arith.subf %272, %284 : vector<16x32xf32>
    %cst_76 = arith.constant 9.99999974E-6 : f32
    %286 = vector.broadcast %cst_76 : f32 to vector<16x1xf32>
    %287 = arith.addf %283, %286 : vector<16x1xf32>
    %288 = math.rsqrt %287 : vector<16x1xf32>
    %289 = vector.broadcast %288 : vector<16x1xf32> to vector<16x32xf32>
    %290 = arith.mulf %285, %289 : vector<16x32xf32>
    %291 = vector.shape_cast %4 : vector<32xf32> to vector<1x32xf32>
    %292 = vector.broadcast %291 : vector<1x32xf32> to vector<16x32xf32>
    %293 = arith.mulf %290, %292 : vector<16x32xf32>
    %294 = vector.shape_cast %6 : vector<32xf32> to vector<1x32xf32>
    %295 = vector.broadcast %294 : vector<1x32xf32> to vector<16x32xf32>
    %296 = arith.addf %293, %295 : vector<16x32xf32>
    %c0_77 = arith.constant 0 : index
    %c0_78 = arith.constant 0 : index
    %297 = vector.load %arg4[%c0_77, %c0_78] : memref<16x32xf32, #tpu.memory_space<vmem>>, vector<16x32xf32>
    tpu.vector_store %arg4[%c0_77, %c0_78], %296 {strides = array<i32>} : memref<16x32xf32, #tpu.memory_space<vmem>>, vector<16x32xf32>,
    return
  }
}

</mosaic_0001>

<bundles_post_ra>
// kernel: decoder_forward.1
= control target key start
LH: loop header
LB: loop body
LE: loop exit
PB: predicated region body
PF: predicated region fallthrough
CT: control target
= control target key end

     0   :  { %s2383_s0 = inlined_call_operand.vmem [shape: f32[16,32], index: 0, kind: input, shape index: {}]   ;;  %s2384_s1 = inlined_call_operand.vmem [shape: f32[32,32], index: 1, kind: input, shape index: {}]   ;;  %s2385_s2 = inlined_call_operand.vmem [shape: f32[256,128], index: 2, kind: input, shape index: {}]   ;;  %s2386_s3 = inlined_call_operand.vmem [shape: f32[16,128], index: 3, kind: input, shape index: {}]   ;;  %s2387_s4 = inlined_call_operand.hbm [shape: f32[16,32], index: 4, kind: output, shape index: {}]  }
   0x1   :  { %v35_v0 = vld [vmem:[%s2385_s2 + $0x18] sm:$0xff]  ;;  %v34_v1 = vld [vmem:[%s2385_s2 + $0x10] sm:$0xff]  ;;  %v33_v2 = vld [vmem:[%s2385_s2 + $0x8] sm:$0xff] }
   0x2   :  { %56 = vmatpush.msra.mxu0 %v35_v0 }
   0x3   :  { %9 = vsyncpa [#allocation3], 0  ;;  %v32_v3 = vld [vmem:[%s2385_s2] sm:$0xff]  ;;  %vm37_vm0 = vcmask 261120   ;;  %v1944_v5 = vld [vmem:[%s2383_s0 + $0x8] sm:$0xff]  ;;  %s1879_s29 = smov 96   ;;  %v26_v29 = vlaneseq }
   0x4   :  { %57 = vmatpush.msra.mxu0 %v34_v1  ;;  %v1937_v4 = vld [vmem:[%s2383_s0] sm:$0xff]  ;;  %s1880_s0 = smov 88   ;;  %s1881_s30 = smov 120   ;;  %vm70_vm1 = vcmask 64512   ;;  %v1889_v33 = vmov -1e+30  }
   0x5   :  { %v1951_v6 = vld [vmem:[%s2386_s3] sm:$0xff]  ;;  %s1882_s5 = smov 64   ;;  %s1883_s6 = smov 80   ;;  %v27_v30 = vshrl.u32 %v26_v29, 7  ;;  %v29_v31 = vand.u32 127, %v26_v29  ;;  %vm628_vm3 = vcmask 130048  }
   0x6   :  { %58 = vmatpush.msra.mxu0 %v33_v2  ;;  %v36_v7 = vperm.slane %v1951_v6, 0  ;;  %s1884_s7 = smov 112   ;;  %s1885_s8 = smov 104   ;;  %vm631_vm4 = vcmask 195584  }
   0x7   :  { %s1886_s9 = smov 72   ;;  %s1887_s10 = smov 56   ;;  %vm30_vm2 = vcmp.le.s32.totalorder %v29_v31, %v27_v30 }
   0x8   :  { %59 = vmatpush.msra.mxu0 %v32_v3  ;;  %s1888_s11 = smov 48   ;;  %v2011_v34 = vsel %vm30_vm2, 0.0, %v1889_v33  ;;  %s1890_s12 = smov 40  }
   0x9   :  { %1644 = vmatmul.msk.f32.vlgmr.msra.gmra.mxu0 %vm37_vm0, %v1937_v4  ;;  %s1891_s13 = smov 8   ;;  %s1892_s14 = smov 16  }
   0xa   :  { %s1893_s15 = smov 24   ;;  %s1896_s16 = smov 128  }
  0x11   :  { %1645 = vmatmul.msk.f32.gmra.mxu0 %vm37_vm0, %v1944_v5 }
  0x86   :  { %v61_v8 = vpop.f32.mrf.mxu0 }
  0x87   :  { %v1954_v9 = vadd.f32 %v61_v8, %v36_v7 }
  0x89   :  { %68 = vrot.lane.b32.xlu0 %v1954_v9, %s1879_s29 }
  0x8e   :  { %v64_v10 = vpop.f32.mrf.mxu0 }
  0x8f   :  { %v1958_v11 = vadd.f32 %v64_v10, %v36_v7 }
  0x91   :  { %230 = vrot.lane.b32.xlu2 %v1958_v11, %s1880_s0  ;;  %96 = vrot.lane.b32.xlu1 %v1958_v11, %s1879_s29 }
  0x99   :  { %228 = vrot.lane.b32.xlu2 %v1958_v11, %s1881_s30  ;;  %146 = vrot.lane.b32.xlu1 %v1954_v9, %s1882_s5 }
  0xa1   :  { %336 = vrot.lane.b32.xlu2 %v1954_v9, %s1883_s6  ;;  %202 = vrot.lane.b32.xlu1 %v1954_v9, %s1880_s0 }
  0xa9   :  { %334 = vrot.lane.b32.xlu2 %v1954_v9, %s1884_s7  ;;  %200 = vrot.lane.b32.xlu1 %v1954_v9, %s1881_s30 }
  0xb1   :  { %468 = vrot.lane.b32.xlu2 %v1954_v9, %s1885_s8  ;;  %470 = vrot.lane.b32.xlu1 %v1954_v9, %s1886_s9 }
  0xb9   :  { %362 = vrot.lane.b32.xlu2 %v1958_v11, %s1884_s7  ;;  %364 = vrot.lane.b32.xlu1 %v1958_v11, %s1883_s6 }
  0xc1   :  { %496 = vrot.lane.b32.xlu2 %v1958_v11, %s1885_s8  ;;  %498 = vrot.lane.b32.xlu1 %v1958_v11, %s1886_s9 }
  0xc9   :  { %172 = vrot.lane.b32.xlu2 %v1958_v11, %s1882_s5 }
  0xd1   :  { %280 = vrot.lane.b32.xlu2 %v1954_v9, %s1887_s10 }
  0xd9   :  { %414 = vrot.lane.b32.xlu2 %v1954_v9, %s1888_s11 }
  0xeb   :  { %v231_v12 = vpop.permute.xlu2 %230 }
  0xf3   :  { %v229_v13 = vpop.permute.xlu2 %228 }
  0xfb   :  { %v337_v14 = vpop.permute.xlu2 %336  ;;  %v69_v15 = vpop.permute.xlu0 %68 }
  0xfc   :  { %1646 = vmatpush.xpose.msk.msra.mxu1 %vm70_vm1, %v69_v15 }
  0xff   :  { %1647 = vmatmul.msk.f32.vlgmr.msra.gmra.mxu1 %vm70_vm1, %v1954_v9 }
 0x103   :  { %v97_v16 = vpop.permute.xlu1 %96  ;;  %v335_v17 = vpop.permute.xlu2 %334 }
 0x104   :  { %1648 = vmatpush.xpose.msk.msra.mxu2 %vm70_vm1, %v97_v16 }
 0x107   :  { %1649 = vmatmul.msk.f32.vlgmr.msra.gmra.mxu2 %vm70_vm1, %v1958_v11 }
 0x108   :  { %1654 = vmatpush.xpose.msk.msrb.mxu2 %vm70_vm1, %v231_v12 }
 0x10b   :  { %v469_v18 = vpop.permute.xlu2 %468  ;;  %v147_v19 = vpop.permute.xlu1 %146 }
 0x10c   :  { %1658 = vmatpush.xpose.msk.msra.mxu2 %vm70_vm1, %v337_v14  ;;  %167 = vmatpush.msrb.mxu1 %v147_v19 }
 0x10f   :  { %1655 = vmatmul.msk.f32.vlgmr.msrb.gmra.mxu2 %vm70_vm1, %v229_v13 }
 0x113   :  { %v363_v20 = vpop.permute.xlu2 %362  ;;  %v203_v21 = vpop.permute.xlu1 %202 }
 0x114   :  { %1652 = vmatpush.xpose.msk.msra.mxu1 %vm70_vm1, %v203_v21 }
 0x117   :  { %1659 = vmatmul.msk.f32.vlgmr.msra.gmra.mxu2 %vm70_vm1, %v335_v17 }
 0x11b   :  { %v497_v22 = vpop.permute.xlu2 %496  ;;  %v2003_v23 = vpop.permute.xlu1 %200 }
 0x123   :  { %v173_v24 = vpop.permute.xlu2 %172  ;;  %v471_v25 = vpop.permute.xlu1 %470 }
 0x124   :  { %1664 = vmatpush.xpose.msk.msrb.mxu2 %vm70_vm1, %v471_v25  ;;  %193 = vmatpush.msra.mxu3 %v173_v24 }
 0x127   :  { %1665 = vmatmul.msk.f32.vlgmr.msrb.gmra.mxu2 %vm70_vm1, %v469_v18 }
 0x12b   :  { %v281_v26 = vpop.permute.xlu2 %280  ;;  %v365_v27 = vpop.permute.xlu1 %364 }
 0x12c   :  { %301 = vmatpush.msrb.mxu3 %v281_v26  ;;  %1660 = vmatpush.xpose.msk.msrb.mxu0 %vm70_vm1, %v365_v27 }
 0x12f   :  { %1661 = vmatmul.msk.f32.vlgmr.msrb.gmra.mxu0 %vm70_vm1, %v363_v20 }
 0x133   :  { %v499_v28 = vpop.permute.xlu1 %498 }
 0x134   :  { %1666 = vmatpush.xpose.msk.msra.mxu0 %vm70_vm1, %v499_v28 }
 0x137   :  { %1667 = vmatmul.msk.f32.vlgmr.msra.gmra.mxu0 %vm70_vm1, %v497_v22 }
 0x17c   :  { %v92_v32 = vpop.f32.mrf.mxu1 }
 0x17d   :  { %v122_v35 = vmul.f32 0.35355338, %v92_v32 }
 0x17f   :  { %v124_v36 = vadd.f32 %v122_v35, %v2011_v34 }
 0x181   :  { %v126_v37 = vsel %vm70_vm1, %v124_v36, -inf }
 0x182   :  { %127 = vmax.xlane.f32.xlu0 %v126_v37 }
 0x18a   :  { %v119_v38 = vpop.f32.mrf.mxu2 }
 0x18b   :  { %v123_v39 = vmul.f32 0.35355338, %v119_v38 }
 0x18d   :  { %v125_v40 = vadd.f32 %v123_v39, %v2011_v34 }
 0x18f   :  { %v129_v41 = vsel %vm70_vm1, %v125_v40, -inf }
 0x190   :  { %130 = vmax.xlane.f32.xlu0 %v129_v41 }
 0x192   :  { %v253_v42 = vpop.f32.mrf.mxu2 }
 0x193   :  { %v257_v43 = vmul.f32 0.35355338, %v253_v42 }
 0x195   :  { %v259_v44 = vadd.f32 %v257_v43, %v2011_v34 }
 0x197   :  { %v263_v45 = vsel %vm70_vm1, %v259_v44, -inf }
 0x198   :  { %264 = vmax.xlane.f32.xlu2 %v263_v45 }
 0x19a   :  { %v359_v46 = vpop.f32.mrf.mxu2 }
 0x19b   :  { %v390_v47 = vmul.f32 0.35355338, %v359_v46 }
 0x19d   :  { %v392_v48 = vadd.f32 %v390_v47, %v2011_v34 }
 0x19f   :  { %v394_v49 = vsel %vm70_vm1, %v392_v48, -inf }
 0x1a0   :  { %395 = vmax.xlane.f32.xlu0 %v394_v49 }
 0x1aa   :  { %v493_v50 = vpop.f32.mrf.mxu2 }
 0x1ab   :  { %v524_v51 = vmul.f32 0.35355338, %v493_v50 }
 0x1ac   :  { %v387_v52 = vpop.f32.mrf.mxu0 }
 0x1ad   :  { %v526_v53 = vadd.f32 %v524_v51, %v2011_v34  ;;  %v391_v59 = vmul.f32 0.35355338, %v387_v52 }
 0x1af   :  { %v528_v54 = vsel %vm70_vm1, %v526_v53, -inf  ;;  %v393_v60 = vadd.f32 %v391_v59, %v2011_v34 }
 0x1b0   :  { %529 = vmax.xlane.f32.xlu0 %v528_v54 }
 0x1b1   :  { %v397_v61 = vsel %vm70_vm1, %v393_v60, -inf }
 0x1b4   :  { %v521_v55 = vpop.f32.mrf.mxu0 }
 0x1b5   :  { %v525_v56 = vmul.f32 0.35355338, %v521_v55 }
 0x1b7   :  { %v527_v57 = vadd.f32 %v525_v56, %v2011_v34 }
 0x1b9   :  { %v531_v58 = vsel %vm70_vm1, %v527_v57, -inf }
 0x1ba   :  { %532 = vmax.xlane.f32.xlu2 %v531_v58 }
 0x1c4   :  { %548 = vrot.lane.b32.xlu0 %v1954_v9, %s1890_s12  ;;  %v415_v9 = vpop.permute.xlu2 %414 }
 0x1d2   :  { %574 = vrot.lane.b32.xlu2 %v1958_v11, %s1890_s12 }
 0x1ee   :  { %398 = vmax.xlane.f32.xlu0 %v397_v61 }
 0x1f5   :  { %v128_v62 = vpop.xlane.xlu0 %127 }
 0x1f6   :  { %v132_v63 = vsub.f32 %v124_v36, %v128_v62 }
 0x1f8   :  { %v134_v0 = vmul.f32 1.442695, %v132_v63 }
 0x1fa   :  { %1774 = vpow2.f32 %v134_v0 }
 0x200   :  { %v1775_v1 = vpop.eup %1774 }
 0x201   :  { %1650 = vmatmul.msk.f32.vlgmr.msrb.gmra.mxu1 %vm70_vm1, %v1775_v1  ;;  %v138_v31 = vsel %vm70_vm1, %v1775_v1, 0.0 }
 0x203   :  { %v131_v2 = vpop.xlane.xlu0 %130 }
 0x204   :  { %v133_v3 = vsub.f32 %v125_v40, %v131_v2 }
 0x206   :  { %v136_v7 = vmul.f32 1.442695, %v133_v3 }
 0x208   :  { %1776 = vpow2.f32 %v136_v7 }
 0x209   :  { %1653 = vmatmul.msk.f32.vlgmr.msra.gmra.mxu1 %vm70_vm1, %v2003_v23 }
 0x20b   :  { %v265_v17 = vpop.xlane.xlu2 %264 }
 0x20c   :  { %v267_v19 = vsub.f32 %v259_v44, %v265_v17  ;;  %v637_v17 = vld [vmem:[%s2385_s2 + $0x78] sm:$0xff] }
 0x20d   :  { %657 = vmatpush.msra.mxu2 %v637_v17 }
 0x20e   :  { %v2032_v8 = vpop.eup %1776  ;;  %v270_v21 = vmul.f32 1.442695, %v267_v19  ;;  %v635_v19 = vld [vmem:[%s2385_s2 + $0x68] sm:$0xff] }
 0x20f   :  { %1651 = vmatmul.msk.f32.vlgmr.msra.gmra.mxu3 %vm70_vm1, %v2032_v8 }
 0x210   :  { %435 = vmatpush.msra.mxu3 %v415_v9 }
 0x213   :  { %v396_v10 = vpop.xlane.xlu0 %395 }
 0x214   :  { %v400_v12 = vsub.f32 %v392_v48, %v396_v10 }
 0x216   :  { %v402_v13 = vmul.f32 1.442695, %v400_v12 }
 0x218   :  { %1778 = vpow2.f32 %v402_v13 }
 0x21e   :  { %v1779_v14 = vpop.eup %1778 }
 0x21f   :  { %v406_v15 = vsel %vm70_vm1, %v1779_v14, 0.0 }
 0x220   :  { %407 = vadd.xlane.f32.xlu0 %v406_v15 }
 0x223   :  { %v530_v16 = vpop.xlane.xlu0 %529 }
 0x224   :  { %v534_v18 = vsub.f32 %v526_v53, %v530_v16  ;;  %v141_v16 = vsel %vm70_vm1, %v2032_v8, 0.0  ;;  %v634_v8 = vld [vmem:[%s2385_s2 + $0x60] sm:$0xff] }
 0x226   :  { %v536_v20 = vmul.f32 1.442695, %v534_v18  ;;  %v636_v18 = vld [vmem:[%s2385_s2 + $0x70] sm:$0xff] }
 0x227   :  { %658 = vmatpush.msra.mxu2 %v636_v18 }
 0x228   :  { %1780 = vpow2.f32 %v536_v20 }
 0x229   :  { %1782 = vpow2.f32 %v270_v21  ;;  %659 = vmatpush.msra.mxu2 %v635_v19 }
 0x22b   :  { %660 = vmatpush.msra.mxu2 %v634_v8 }
 0x22d   :  { %v533_v22 = vpop.xlane.xlu2 %532 }
 0x22e   :  { %v1781_v23 = vpop.eup %1780  ;;  %v535_v24 = vsub.f32 %v527_v57, %v533_v22 }
 0x22f   :  { %v540_v25 = vsel %vm70_vm1, %v1781_v23, 0.0  ;;  %v1783_v27 = vpop.eup %1782 }
 0x230   :  { %v538_v26 = vmul.f32 1.442695, %v535_v24  ;;  %541 = vadd.xlane.f32.xlu0 %v540_v25  ;;  %v275_v28 = vsel %vm70_vm1, %v1783_v27, 0.0 }
 0x232   :  { %1784 = vpow2.f32 %v538_v26 }
 0x235   :  { %v575_v49 = vpop.permute.xlu2 %574 }
 0x236   :  { %v549_v32 = vpop.permute.xlu0 %548 }
 0x238   :  { %276 = vadd.xlane.f32.xlu0 %v275_v28  ;;  %v1785_v29 = vpop.eup %1784 }
 0x239   :  { %v543_v30 = vsel %vm70_vm1, %v1785_v29, 0.0 }
 0x240   :  { %544 = vadd.xlane.f32.xlu0 %v543_v30 }
 0x248   :  { %139 = vadd.xlane.f32.xlu0 %v138_v31 }
 0x261   :  { %v399_v33 = vpop.xlane.xlu0 %398 }
 0x262   :  { %v401_v35 = vsub.f32 %v393_v60, %v399_v33 }
 0x264   :  { %v404_v36 = vmul.f32 1.442695, %v401_v35 }
 0x266   :  { %1786 = vpow2.f32 %v404_v36 }
 0x26c   :  { %v1787_v37 = vpop.eup %1786 }
 0x26d   :  { %v409_v38 = vsel %vm70_vm1, %v1787_v37, 0.0 }
 0x26e   :  { %410 = vadd.xlane.f32.xlu2 %v409_v38 }
 0x27e   :  { %v2042_v39 = vpop.f32.mrf.mxu1 }
 0x286   :  { %v225_v40 = vpop.f32.mrf.mxu1 }
 0x287   :  { %v256_v41 = vmul.f32 0.35355338, %v225_v40 }
 0x289   :  { %v258_v42 = vadd.f32 %v256_v41, %v2011_v34 }
 0x28b   :  { %v260_v43 = vsel %vm70_vm1, %v258_v42, -inf }
 0x28c   :  { %261 = vmax.xlane.f32.xlu1 %v260_v43 }
 0x292   :  { %v2057_v53 = vpop.f32.mrf.mxu3 }
 0x293   :  { %v408_v50 = vpop.xlane.xlu0 %407 }
 0x2a3   :  { %v542_v51 = vpop.xlane.xlu0 %541 }
 0x2a5   :  { %306 = vrot.lane.b32.xlu1 %v1958_v11, %s1887_s10 }
 0x2ab   :  { %v277_v56 = vpop.xlane.xlu0 %276 }
 0x2ad   :  { %440 = vrot.lane.b32.xlu1 %v1958_v11, %s1888_s11  ;;  %s1895_s11 = smov [#allocation2]  }
 0x2ae   :  { %s1630_s12 = sshll.u32 %s1895_s11, 4  ;;  %s1631_s12 = int_to_ptr.vmem [resolvable:$true] %s1630_s12 }
 0x2b3   :  { %v545_v9 = vpop.xlane.xlu0 %544 }
 0x2bb   :  { %v140_v20 = vpop.xlane.xlu0 %139 }
 0x2e1   :  { %v411_v59 = vpop.xlane.xlu2 %410 }
 0x2ff   :  { %v262_v44 = vpop.xlane.xlu1 %261 }
 0x300   :  { %v266_v45 = vsub.f32 %v258_v42, %v262_v44 }
 0x302   :  { %v268_v46 = vmul.f32 1.442695, %v266_v45 }
 0x304   :  { %1788 = vpow2.f32 %v268_v46 }
 0x30a   :  { %v1789_v47 = vpop.eup %1788 }
 0x30b   :  { %1656 = vmatmul.msk.f32.vlgmr.msrb.gmra.mxu3 %vm70_vm1, %v1789_v47  ;;  %v272_v48 = vsel %vm70_vm1, %v1789_v47, 0.0 }
 0x30c   :  { %569 = vmatpush.msrb.mxu3 %v549_v32  ;;  %273 = vadd.xlane.f32.xlu1 %v272_v48  ;;  %v1894_v48 = vmov 32.0  }
 0x313   :  { %1662 = vmatmul.msk.f32.vlgmr.msra.gmra.mxu3 %vm70_vm1, %v1779_v14 }
 0x317   :  { %v307_v34 = vpop.permute.xlu1 %306 }
 0x318   :  { %327 = vmatpush.msrb.mxu1 %v307_v34 }
 0x319   :  { %1657 = vmatmul.msk.f32.vlgmr.msrb.gmra.mxu1 %vm70_vm1, %v1783_v27 }
 0x31b   :  { %1668 = vmatmul.msk.f32.vlgmr.msrb.gmra.mxu3 %vm70_vm1, %v1781_v23 }
 0x31f   :  { %v441_v11 = vpop.permute.xlu1 %440 }
 0x320   :  { %461 = vmatpush.msra.mxu1 %v441_v11 }
 0x321   :  { %1663 = vmatmul.msk.f32.vlgmr.msra.gmra.mxu1 %vm70_vm1, %v1787_v37 }
 0x322   :  { %595 = vmatpush.msrb.mxu1 %v575_v49 }
 0x329   :  { %1669 = vmatmul.msk.f32.vlgmr.msrb.gmra.mxu1 %vm70_vm1, %v1785_v29 }
 0x37f   :  { %v274_v52 = vpop.xlane.xlu1 %273 }
 0x380   :  { %1790 = vrcp.f32 %v274_v52 }
 0x381   :  { %1792 = vrcp.f32 %v408_v50 }
 0x382   :  { %1794 = vrcp.f32 %v277_v56  ;;  %v764_v56 = vld [vmem:[%s2385_s2 + $0x58] sm:$0xff] }
 0x383   :  { %1796 = vrcp.f32 %v542_v51  ;;  %790 = vmatpush.msra.mxu3 %v764_v56 }
 0x384   :  { %1798 = vrcp.f32 %v411_v59  ;;  %v761_v59 = vld [vmem:[%s2385_s2 + $0x40] sm:$0xff] }
 0x385   :  { %1800 = vrcp.f32 %v545_v9  ;;  %v730_v9 = vld [vmem:[%s2385_s2 + $0x38] sm:$0xff] }
 0x386   :  { %v1791_v54 = vpop.eup %1790  ;;  %1802 = vrcp.f32 %v140_v20  ;;  %750 = vmatpush.msrb.mxu0 %v730_v9 }
 0x387   :  { %v1793_v58 = vpop.eup %1792 }
 0x388   :  { %v1795_v60 = vpop.eup %1794 }
 0x389   :  { %v1797_v1 = vpop.eup %1796 }
 0x38a   :  { %v1799_v2 = vpop.eup %1798 }
 0x38b   :  { %v1801_v13 = vpop.eup %1800 }
 0x38c   :  { %v1803_v21 = vpop.eup %1802 }
 0x38d   :  { %v198_v23 = vmul.f32 %v1803_v21, %v2042_v39  ;;  %v638_v39 = vperm.slane %v1951_v6, 3 }
 0x38e   :  { %v303_v55 = vpop.f32.mrf.mxu3 }
 0x38f   :  { %v332_v57 = vmul.f32 %v1791_v54, %v303_v55 }
 0x391   :  { %604 = vrot.lane.b32.xlu1 %v332_v57, %s1891_s13  ;;  %v763_v57 = vld [vmem:[%s2385_s2 + $0x50] sm:$0xff] }
 0x392   :  { %791 = vmatpush.msra.mxu3 %v763_v57 }
 0x396   :  { %v329_v61 = vpop.f32.mrf.mxu1  ;;  %v437_v62 = vpop.f32.mrf.mxu3 }
 0x397   :  { %v333_v63 = vmul.f32 %v1795_v60, %v329_v61  ;;  %v466_v0 = vmul.f32 %v1793_v58, %v437_v62  ;;  %v762_v58 = vld [vmem:[%s2385_s2 + $0x48] sm:$0xff]  ;;  %v20_v60 = vld [vmem:[%s2384_s1] sm:$0xff]  ;;  %v22_v62 = vld [vmem:[%s2384_s1 + $0x10] sm:$0xff] }
 0x398   :  { %792 = vmatpush.msra.mxu3 %v762_v58  ;;  %v21_v61 = vld [vmem:[%s2384_s1 + $0x8] sm:$0xff] }
 0x399   :  { %612 = vrot.lane.b32.xlu0 %v466_v0, %s1892_s14  ;;  %606 = vrot.lane.b32.xlu1 %v333_v63, %s1891_s13 }
 0x39a   :  { %793 = vmatpush.msra.mxu3 %v761_v59 }
 0x39b   :  { %1674 = vmatmul.msk.f32.vlgmr.msra.gmra.mxu3 %vm37_vm0, %v20_v60 }
 0x39e   :  { %v463_v3 = vpop.f32.mrf.mxu1  ;;  %v571_v7 = vpop.f32.mrf.mxu3 }
 0x39f   :  { %v467_v10 = vmul.f32 %v1799_v2, %v463_v3  ;;  %v600_v12 = vmul.f32 %v1797_v1, %v571_v7  ;;  %v23_v3 = vld [vmem:[%s2384_s1 + $0x18] sm:$0xff] }
 0x3a1   :  { %620 = vrot.lane.b32.xlu2 %v600_v12, %s1893_s15  ;;  %614 = vrot.lane.b32.xlu1 %v467_v10, %s1892_s14  ;;  %v729_v10 = vld [vmem:[%s2385_s2 + $0x30] sm:$0xff]  ;;  %v728_v12 = vld [vmem:[%s2385_s2 + $0x28] sm:$0xff] }
 0x3a2   :  { %751 = vmatpush.msrb.mxu0 %v729_v10 }
 0x3a3   :  { %1675 = vmatmul.msk.f32.gmra.mxu3 %vm37_vm0, %v21_v61 }
 0x3a4   :  { %752 = vmatpush.msrb.mxu0 %v728_v12 }
 0x3a6   :  { %v597_v14 = vpop.f32.mrf.mxu1 }
 0x3a7   :  { %v601_v15 = vmul.f32 %v1801_v13, %v597_v14  ;;  %v727_v13 = vld [vmem:[%s2385_s2 + $0x20] sm:$0xff] }
 0x3a8   :  { %753 = vmatpush.msrb.mxu0 %v727_v13 }
 0x3a9   :  { %622 = vrot.lane.b32.xlu1 %v601_v15, %s1893_s15 }
 0x3ab   :  { %1676 = vmatmul.msk.f32.gmra.mxu3 %vm37_vm0, %v22_v62 }
 0x3b3   :  { %1677 = vmatmul.msk.f32.gmra.mxu3 %vm37_vm0, %v23_v3 }
 0x3c3   :  { %142 = vadd.xlane.f32.xlu0 %v141_v16 }
 0x3fb   :  { %v621_v26 = vpop.permute.xlu2 %620 }
 0x403   :  { %v605_v22 = vpop.permute.xlu1 %604 }
 0x404   :  { %v626_v24 = vsel %vm70_vm1, %v198_v23, %v605_v22  ;;  %v2146_v22 = vperm.slane %v1951_v6, 5 }
 0x40b   :  { %v613_v25 = vpop.permute.xlu0 %612  ;;  %v607_v29 = vpop.permute.xlu1 %606 }
 0x40c   :  { %v629_v27 = vsel %vm628_vm3, %v626_v24, %v613_v25  ;;  %v2149_v25 = vperm.slane %v1951_v6, 6 }
 0x40d   :  { %v632_v28 = vsel %vm631_vm4, %v629_v27, %v621_v26 }
 0x40e   :  { %1670 = vmatmul.msk.f32.vlgmr.msra.gmra.mxu2 %vm37_vm0, %v632_v28  ;;  %v765_v28 = vperm.slane %v1951_v6, 2 }
 0x413   :  { %v615_v31 = vpop.permute.xlu1 %614 }
 0x41b   :  { %v623_v36 = vpop.permute.xlu1 %622 }
 0x436   :  { %v143_v30 = vpop.xlane.xlu0 %142 }
 0x437   :  { %1804 = vrcp.f32 %v143_v30 }
 0x438   :  { %1806 = vrcp.f32 %v1894_v48 }
 0x43d   :  { %v1805_v32 = vpop.eup %1804 }
 0x43e   :  { %v199_v33 = vmul.f32 %v1805_v32, %v2057_v53  ;;  %v1807_v34 = vpop.eup %1806 }
 0x43f   :  { %v677_v11 = vmul.f32 32.0, %v1807_v34  ;;  %vm681_vm5 = vweird.f32 %v1807_v34 }
 0x440   :  { %v627_v35 = vsel %vm70_vm1, %v199_v33, %v607_v29  ;;  %v795_v29 = vpop.f32.mrf.mxu3 }
 0x441   :  { %v630_v37 = vsel %vm628_vm3, %v627_v35, %v615_v31  ;;  %v678_v49 = vsub.f32 1.0, %v677_v11  ;;  %v796_v30 = vadd.f32 %v795_v29, %v765_v28 }
 0x442   :  { %v633_v38 = vsel %vm631_vm4, %v630_v37, %v623_v36 }
 0x443   :  { %1671 = vmatmul.msk.f32.gmra.mxu2 %vm37_vm0, %v633_v38  ;;  %v679_v50 = vmul.f32 %v1807_v34, %v678_v49 }
 0x445   :  { %v680_v51 = vadd.f32 %v1807_v34, %v679_v50 }
 0x447   :  { %v2094_v52 = vsel %vm681_vm5, %v1807_v34, %v680_v51 }
 0x448   :  { %v798_v35 = vpop.f32.mrf.mxu3 }
 0x449   :  { %v799_v36 = vadd.f32 %v798_v35, %v765_v28 }
 0x44b   :  { %v2161_v37 = vpack.i.bf16 %v796_v30, %v799_v36  ;;  %1678 = vmatpush.xpose.msk.msra.mxu1 %vm70_vm1, %v799_v36 }
 0x44f   :  { %1679 = vmatpush.xpose.msk.msra.mxu1 %vm70_vm1, %v796_v30 }
 0x491   :  { %v662_v40 = vpop.f32.mrf.mxu2 }
 0x492   :  { %v663_v41 = vadd.f32 %v662_v40, %v638_v39  ;;  %v801_v40 = vpop.f32.mrf.mxu3 }
 0x494   :  { %v668_v42 = vadd.f32 %v663_v41, %v1937_v4 }
 0x496   :  { %v670_v43 = vsel %vm37_vm0, %v668_v42, 0.0 }
 0x497   :  { %671 = vadd.xlane.f32.xlu2 %v670_v43 }
 0x4af   :  { %949 = vrot.lane.b32.xlu2 %v796_v30, %s1881_s30 }
 0x4b7   :  { %1735 = vrot.lane.b32.xlu2 %v2161_v37, %s1879_s29 }
 0x4c6   :  { %v665_v44 = vpop.f32.mrf.mxu2 }
 0x4c7   :  { %v666_v45 = vadd.f32 %v665_v44, %v638_v39 }
 0x4c9   :  { %v669_v46 = vadd.f32 %v666_v45, %v1944_v5 }
 0x4cb   :  { %v673_v47 = vsel %vm37_vm0, %v669_v46, 0.0 }
 0x4cc   :  { %674 = vadd.xlane.f32.xlu1 %v673_v47 }
 0x50a   :  { %v672_v4 = vpop.xlane.xlu2 %671 }
 0x50b   :  { %v683_v53 = vmul.f32 %v2094_v52, %v672_v4  ;;  %v731_v4 = vperm.slane %v1951_v6, 1 }
 0x50d   :  { %v685_v54 = vsub.f32 %v668_v42, %v683_v53  ;;  %v802_v42 = vadd.f32 %v801_v40, %v765_v28 }
 0x50f   :  { %v687_v55 = vmul.f32 %v685_v54, %v685_v54  ;;  %981 = vrot.lane.b32.xlu2 %v802_v42, %s1881_s30 }
 0x511   :  { %v689_v5 = vsel %vm37_vm0, %v687_v55, 0.0 }
 0x512   :  { %690 = vadd.xlane.f32.xlu0 %v689_v5  ;;  %v950_v51 = vpop.permute.xlu2 %949 }
 0x517   :  { %1097 = vrot.lane.b32.xlu2 %v799_v36, %s1884_s7 }
 0x51a   :  { %v1736_v53 = vpop.permute.xlu2 %1735 }
 0x51b   :  { %v1738_v55 = vunpack.i.h.bf16 %v1736_v53  ;;  %v1737_v5 = vunpack.i.l.bf16 %v1736_v53 }
 0x51d   :  { %910 = vmatpush.msrb.mxu2 %v1737_v5 }
 0x51f   :  { %1095 = vrot.lane.b32.xlu2 %v796_v30, %s1884_s7  ;;  %911 = vmatpush.msrb.mxu2 %v1738_v55 }
 0x53f   :  { %v675_v63 = vpop.xlane.xlu1 %674 }
 0x540   :  { %v684_v0 = vmul.f32 %v2094_v52, %v675_v63 }
 0x542   :  { %v2123_v1 = vsub.f32 %v669_v46, %v684_v0  ;;  %v804_v46 = vpop.f32.mrf.mxu3 }
 0x543   :  { %v2168_v48 = vadd.f32 %v804_v46, %v765_v28 }
 0x544   :  { %v688_v2 = vmul.f32 %v2123_v1, %v2123_v1 }
 0x545   :  { %v2172_v11 = vpack.i.bf16 %v802_v42, %v2168_v48  ;;  %1681 = vmatpush.xpose.msk.msrb.mxu1 %vm70_vm1, %v2168_v48 }
 0x546   :  { %v692_v7 = vsel %vm37_vm0, %v688_v2, 0.0 }
 0x547   :  { %693 = vadd.xlane.f32.xlu0 %v692_v7 }
 0x549   :  { %1682 = vmatpush.xpose.msk.msrb.mxu1 %vm70_vm1, %v802_v42 }
 0x55b   :  { %951 = vrot.lane.b32.xlu0 %v799_v36, %s1881_s30 }
 0x563   :  { %1740 = vrot.lane.b32.xlu0 %v2172_v11, %s1879_s29 }
 0x569   :  { %v982_v3 = vpop.permute.xlu2 %981 }
 0x56b   :  { %1745 = vrot.lane.b32.xlu0 %v2161_v37, %s1880_s0 }
 0x573   :  { %1127 = vrot.lane.b32.xlu0 %v802_v42, %s1884_s7 }
 0x585   :  { %v691_v14 = vpop.xlane.xlu0 %690 }
 0x586   :  { %v695_v15 = vmul.f32 %v691_v14, %v2094_v52 }
 0x588   :  { %v697_v16 = vadd.f32 1e-05, %v695_v15  ;;  %v1098_v15 = vpop.permute.xlu2 %1097 }
 0x58a   :  { %1808 = vrsqrt.f32 %v697_v16  ;;  %vm705_vm7 = vweird.f32 %v697_v16 }
 0x590   :  { %v1809_v17 = vpop.eup %1808 }
 0x591   :  { %v700_v18 = vmul.f32 %v1809_v17, %v697_v16  ;;  %vm706_vm6 = vweird.f32 %v1809_v17 }
 0x592   :  { %vm707_vm8 = vmor %vm705_vm7, %vm706_vm6 }
 0x593   :  { %v701_v19 = vmul.f32 %v1809_v17, %v700_v18 }
 0x595   :  { %v702_v8 = vmul.f32 0.5, %v701_v19 }
 0x597   :  { %v703_v20 = vsub.f32 1.5, %v702_v8 }
 0x599   :  { %v704_v21 = vmul.f32 %v1809_v17, %v703_v20 }
 0x59b   :  { %v708_v23 = vsel %vm707_vm8, %v1809_v17, %v704_v21  ;;  %v1096_v17 = vpop.permute.xlu2 %1095 }
 0x59c   :  { %v719_v24 = vmul.f32 %v708_v23, %v685_v54 }
 0x59e   :  { %v722_v26 = vmul.f32 %v2146_v22, %v719_v24 }
 0x5a0   :  { %v2153_v27 = vadd.f32 %v2149_v25, %v722_v26 }
 0x5a2   :  { %1672 = vmatmul.msk.f32.vlgmr.msrb.gmra.mxu0 %vm37_vm0, %v2153_v27 }
 0x5ba   :  { %v694_v31 = vpop.xlane.xlu0 %693 }
 0x5bb   :  { %v696_v32 = vmul.f32 %v694_v31, %v2094_v52 }
 0x5bd   :  { %v698_v33 = vadd.f32 1e-05, %v696_v32 }
 0x5bf   :  { %1810 = vrsqrt.f32 %v698_v33  ;;  %vm715_vm10 = vweird.f32 %v698_v33 }
 0x5c5   :  { %v1811_v38 = vpop.eup %1810 }
 0x5c6   :  { %v710_v39 = vmul.f32 %v1811_v38, %v698_v33  ;;  %vm716_vm9 = vweird.f32 %v1811_v38 }
 0x5c7   :  { %vm717_vm11 = vmor %vm715_vm10, %vm716_vm9 }
 0x5c8   :  { %v711_v41 = vmul.f32 %v1811_v38, %v710_v39 }
 0x5ca   :  { %v712_v43 = vmul.f32 0.5, %v711_v41 }
 0x5cc   :  { %v713_v44 = vsub.f32 1.5, %v712_v43 }
 0x5cd   :  { %v952_v57 = vpop.permute.xlu0 %951 }
 0x5ce   :  { %v714_v45 = vmul.f32 %v1811_v38, %v713_v44 }
 0x5d0   :  { %v718_v47 = vsel %vm717_vm11, %v1811_v38, %v714_v45 }
 0x5d1   :  { %v720_v34 = vmul.f32 %v718_v47, %v2123_v1 }
 0x5d3   :  { %v723_v49 = vmul.f32 %v2146_v22, %v720_v34 }
 0x5d5   :  { %v2181_v50 = vadd.f32 %v2149_v25, %v723_v49  ;;  %v1741_v59 = vpop.permute.xlu0 %1740 }
 0x5d6   :  { %v1743_v60 = vunpack.i.h.bf16 %v1741_v59  ;;  %v1742_v61 = vunpack.i.l.bf16 %v1741_v59 }
 0x5d7   :  { %1673 = vmatmul.msk.f32.gmra.mxu0 %vm37_vm0, %v2181_v50 }
 0x5d8   :  { %939 = vmatpush.msra.mxu0 %v1742_v61 }
 0x5da   :  { %940 = vmatpush.msra.mxu0 %v1743_v60 }
 0x5dd   :  { %v1746_v62 = vpop.permute.xlu0 %1745 }
 0x5de   :  { %v1748_v63 = vunpack.i.h.bf16 %v1746_v62  ;;  %v1747_v0 = vunpack.i.l.bf16 %v1746_v62 }
 0x5e0   :  { %1056 = vmatpush.msrb.mxu0 %v1747_v0 }
 0x5e2   :  { %1057 = vmatpush.msrb.mxu0 %v1748_v63 }
 0x5e5   :  { %v1128_v16 = vpop.permute.xlu0 %1127 }
 0x61f   :  { %v755_v54 = vpop.f32.mrf.mxu0 }
 0x620   :  { %v756_v56 = vadd.f32 %v755_v54, %v731_v4 }
 0x622   :  { %1093 = vrot.lane.b32.xlu2 %v756_v56, %s1884_s7  ;;  %947 = vrot.lane.b32.xlu1 %v756_v56, %s1881_s30 }
 0x623   :  { %1680 = vmatmul.msk.f32.vlgmr.msra.gmra.mxu1 %vm70_vm1, %v756_v56 }
 0x624   :  { %1686 = vmatpush.xpose.msk.msra.mxu1 %vm70_vm1, %v952_v57 }
 0x628   :  { %1687 = vmatpush.xpose.msk.msra.mxu1 %vm70_vm1, %v950_v51 }
 0x62a   :  { %983 = vrot.lane.b32.xlu1 %v2168_v48, %s1881_s30 }
 0x632   :  { %1241 = vrot.lane.b32.xlu1 %v796_v30, %s1885_s8 }
 0x654   :  { %v758_v6 = vpop.f32.mrf.mxu0 }
 0x655   :  { %v759_v58 = vadd.f32 %v758_v6, %v731_v4 }
 0x657   :  { %979 = vrot.lane.b32.xlu2 %v759_v58, %s1881_s30  ;;  %1683 = vmatmul.msk.f32.vlgmr.msrb.gmra.mxu1 %vm70_vm1, %v759_v58 }
 0x65f   :  { %1243 = vrot.lane.b32.xlu2 %v799_v36, %s1885_s8 }
 0x667   :  { %1239 = vrot.lane.b32.xlu2 %v756_v56, %s1885_s8 }
 0x66f   :  { %1129 = vrot.lane.b32.xlu2 %v2168_v48, %s1884_s7 }
 0x677   :  { %1125 = vrot.lane.b32.xlu2 %v759_v58, %s1884_s7 }
 0x67c   :  { %v1094_v23 = vpop.permute.xlu2 %1093 }
 0x67f   :  { %1273 = vrot.lane.b32.xlu2 %v802_v42, %s1885_s8 }
 0x694   :  { %v948_v1 = vpop.permute.xlu1 %947 }
 0x695   :  { %1688 = vmatmul.msk.f32.vlgmr.msra.gmra.mxu1 %vm70_vm1, %v948_v1 }
 0x69c   :  { %v984_v2 = vpop.permute.xlu1 %983 }
 0x69d   :  { %1689 = vmatpush.xpose.msk.msra.mxu2 %vm70_vm1, %v984_v2 }
 0x6a0   :  { %v833_v7 = vpop.f32.mrf.mxu1 }
 0x6a1   :  { %v865_v9 = vmul.f32 0.35355338, %v833_v7  ;;  %1690 = vmatpush.xpose.msk.msra.mxu2 %vm70_vm1, %v982_v3 }
 0x6a3   :  { %v867_v10 = vsel %vm628_vm3, %v865_v9, -inf }
 0x6a4   :  { %868 = vmax.xlane.f32.xlu0 %v867_v10  ;;  %v1242_v30 = vpop.permute.xlu1 %1241 }
 0x6b1   :  { %v980_v26 = vpop.permute.xlu2 %979 }
 0x6b9   :  { %v1244_v29 = vpop.permute.xlu2 %1243 }
 0x6c1   :  { %v1240_v31 = vpop.permute.xlu2 %1239 }
 0x6c9   :  { %v1130_v38 = vpop.permute.xlu2 %1129 }
 0x6d1   :  { %v1126_v47 = vpop.permute.xlu2 %1125 }
 0x6d4   :  { %v862_v12 = vpop.f32.mrf.mxu1 }
 0x6d5   :  { %v866_v13 = vmul.f32 0.35355338, %v862_v12 }
 0x6d7   :  { %v870_v14 = vsel %vm628_vm3, %v866_v13, -inf }
 0x6d8   :  { %871 = vmax.xlane.f32.xlu1 %v870_v14 }
 0x6d9   :  { %v1274_v34 = vpop.permute.xlu2 %1273 }
 0x6f1   :  { %1271 = vrot.lane.b32.xlu1 %v759_v58, %s1885_s8 }
 0x6f9   :  { %1755 = vrot.lane.b32.xlu1 %v2172_v11, %s1880_s0 }
 0x712   :  { %v976_v18 = vpop.f32.mrf.mxu1 }
 0x713   :  { %v1011_v19 = vmul.f32 0.35355338, %v976_v18 }
 0x715   :  { %v1013_v8 = vsel %vm628_vm3, %v1011_v19, -inf }
 0x716   :  { %1014 = vmax.xlane.f32.xlu0 %v1013_v8 }
 0x717   :  { %v869_v20 = vpop.xlane.xlu0 %868 }
 0x718   :  { %v873_v21 = vsub.f32 %v865_v9, %v869_v20 }
 0x71a   :  { %v875_v24 = vmul.f32 1.442695, %v873_v21 }
 0x71c   :  { %1812 = vpow2.f32 %v875_v24 }
 0x722   :  { %v2216_v28 = vpop.eup %1812 }
 0x723   :  { %1684 = vmatmul.msk.f32.vlgmr.msrb.gmra.mxu2 %vm628_vm3, %v2216_v28 }
 0x724   :  { %1694 = vmatpush.xpose.msk.msrb.mxu2 %vm70_vm1, %v1098_v15 }
 0x728   :  { %1695 = vmatpush.xpose.msk.msrb.mxu2 %vm70_vm1, %v1096_v17 }
 0x72a   :  { %1275 = vrot.lane.b32.xlu0 %v2168_v48, %s1885_s8 }
 0x72b   :  { %1691 = vmatmul.msk.f32.vlgmr.msra.gmra.mxu2 %vm70_vm1, %v980_v26 }
 0x72c   :  { %1702 = vmatpush.xpose.msk.msra.mxu2 %vm70_vm1, %v1244_v29 }
 0x730   :  { %1703 = vmatpush.xpose.msk.msra.mxu2 %vm70_vm1, %v1242_v30 }
 0x733   :  { %1696 = vmatmul.msk.f32.vlgmr.msrb.gmra.mxu2 %vm70_vm1, %v1094_v23 }
 0x73b   :  { %1704 = vmatmul.msk.f32.vlgmr.msra.gmra.mxu2 %vm70_vm1, %v1240_v31 }
 0x74b   :  { %v872_v32 = vpop.xlane.xlu1 %871 }
 0x74c   :  { %v874_v33 = vsub.f32 %v866_v13, %v872_v32 }
 0x74e   :  { %v877_v35 = vmul.f32 1.442695, %v874_v33 }
 0x750   :  { %1814 = vpow2.f32 %v877_v35  ;;  %v879_v35 = vsel %vm628_vm3, %v2216_v28, 0.0 }
 0x756   :  { %v2229_v36 = vpop.eup %1814 }
 0x757   :  { %1685 = vmatmul.msk.f32.vlgmr.msra.gmra.mxu0 %vm628_vm3, %v2229_v36  ;;  %v882_v17 = vsel %vm628_vm3, %v2229_v36, 0.0 }
 0x758   :  { %1697 = vmatpush.xpose.msk.msra.mxu0 %vm70_vm1, %v1130_v38 }
 0x75c   :  { %1698 = vmatpush.xpose.msk.msra.mxu0 %vm70_vm1, %v1128_v16 }
 0x763   :  { %v1272_v39 = vpop.permute.xlu1 %1271 }
 0x76b   :  { %v1756_v40 = vpop.permute.xlu1 %1755 }
 0x76c   :  { %v1757_v41 = vunpack.i.l.bf16 %v1756_v40  ;;  %v1758_v42 = vunpack.i.h.bf16 %v1756_v40 }
 0x76e   :  { %1085 = vmatpush.msrb.mxu1 %v1757_v41 }
 0x770   :  { %1086 = vmatpush.msrb.mxu1 %v1758_v42 }
 0x789   :  { %v1015_v43 = vpop.xlane.xlu0 %1014 }
 0x78a   :  { %v1019_v44 = vsub.f32 %v1011_v19, %v1015_v43 }
 0x78c   :  { %v1021_v45 = vmul.f32 1.442695, %v1019_v44 }
 0x78e   :  { %1816 = vpow2.f32 %v1021_v45 }
 0x794   :  { %v1817_v46 = vpop.eup %1816 }
 0x795   :  { %1692 = vmatmul.msk.f32.vlgmr.msrb.gmra.mxu0 %vm628_vm3, %v1817_v46  ;;  %v1025_v58 = vsel %vm628_vm3, %v1817_v46, 0.0 }
 0x79c   :  { %v1276_v48 = vpop.permute.xlu0 %1275 }
 0x79d   :  { %1699 = vmatmul.msk.f32.vlgmr.msra.gmra.mxu0 %vm70_vm1, %v1126_v47 }
 0x79e   :  { %1705 = vmatpush.xpose.msk.msrb.mxu0 %vm70_vm1, %v1276_v48 }
 0x7a2   :  { %1706 = vmatpush.xpose.msk.msrb.mxu0 %vm70_vm1, %v1274_v34 }
 0x7a5   :  { %1707 = vmatmul.msk.f32.vlgmr.msrb.gmra.mxu0 %vm70_vm1, %v1272_v39 }
 0x7a6   :  { %v2240_v49 = vpop.f32.mrf.mxu2 }
 0x7ae   :  { %v1008_v51 = vpop.f32.mrf.mxu2 }
 0x7af   :  { %v1012_v4 = vmul.f32 0.35355338, %v1008_v51 }
 0x7b1   :  { %v1016_v53 = vsel %vm628_vm3, %v1012_v4, -inf }
 0x7b2   :  { %1017 = vmax.xlane.f32.xlu2 %v1016_v53 }
 0x7b6   :  { %v1122_v54 = vpop.f32.mrf.mxu2 }
 0x7b7   :  { %v1157_v55 = vmul.f32 0.35355338, %v1122_v54 }
 0x7b9   :  { %v1159_v5 = vsel %vm628_vm3, %v1157_v55, -inf }
 0x7ba   :  { %1160 = vmax.xlane.f32.xlu0 %v1159_v5 }
 0x7be   :  { %v1268_v56 = vpop.f32.mrf.mxu2 }
 0x7bf   :  { %v1303_v57 = vmul.f32 0.35355338, %v1268_v56 }
 0x7c1   :  { %v1305_v6 = vsel %vm628_vm3, %v1303_v57, -inf }
 0x7c2   :  { %1306 = vmax.xlane.f32.xlu1 %v1305_v6 }
 0x7ca   :  { %1760 = vrot.lane.b32.xlu2 %v2161_v37, %s1886_s9 }
 0x7ce   :  { %1750 = vrot.lane.b32.xlu0 %v2161_v37, %s1883_s6 }
 0x7d4   :  { %v2252_v59 = vpop.f32.mrf.mxu0 }
 0x7db   :  { %1765 = vrot.lane.b32.xlu1 %v2172_v11, %s1883_s6 }
 0x805   :  { %1026 = vadd.xlane.f32.xlu1 %v1025_v58 }
 0x812   :  { %v2254_v60 = vpop.f32.mrf.mxu0 }
 0x81a   :  { %v1154_v61 = vpop.f32.mrf.mxu0 }
 0x81b   :  { %v1158_v62 = vmul.f32 0.35355338, %v1154_v61 }
 0x81d   :  { %v1162_v63 = vsel %vm628_vm3, %v1158_v62, -inf }
 0x81e   :  { %1163 = vmax.xlane.f32.xlu2 %v1162_v63 }
 0x822   :  { %v1300_v0 = vpop.f32.mrf.mxu0 }
 0x823   :  { %v1304_v1 = vmul.f32 0.35355338, %v1300_v0 }
 0x825   :  { %v1018_v2 = vpop.xlane.xlu2 %1017  ;;  %v1308_v37 = vsel %vm628_vm3, %v1304_v1, -inf }
 0x826   :  { %v1020_v3 = vsub.f32 %v1012_v4, %v1018_v2  ;;  %1309 = vmax.xlane.f32.xlu0 %v1308_v37 }
 0x828   :  { %v1023_v7 = vmul.f32 1.442695, %v1020_v3 }
 0x82a   :  { %1818 = vpow2.f32 %v1023_v7  ;;  %v1418_v7 = vld [vmem:[%s2385_s2 + $0x98] sm:$0xff] }
 0x82b   :  { %1438 = vmatpush.msrb.mxu2 %v1418_v7 }
 0x82d   :  { %v1161_v12 = vpop.xlane.xlu0 %1160  ;;  %v1761_v23 = vpop.permute.xlu2 %1760 }
 0x82e   :  { %v1165_v15 = vsub.f32 %v1157_v55, %v1161_v12  ;;  %v1763_v29 = vunpack.i.h.bf16 %v1761_v23  ;;  %v1416_v12 = vld [vmem:[%s2385_s2 + $0x88] sm:$0xff] }
 0x830   :  { %v1819_v9 = vpop.eup %1818  ;;  %v1167_v18 = vmul.f32 1.442695, %v1165_v15 }
 0x831   :  { %1693 = vmatmul.msk.f32.vlgmr.msrb.gmra.mxu1 %vm628_vm3, %v1819_v9  ;;  %v1028_v10 = vsel %vm628_vm3, %v1819_v9, 0.0  ;;  %v1417_v9 = vld [vmem:[%s2385_s2 + $0x90] sm:$0xff] }
 0x832   :  { %1029 = vadd.xlane.f32.xlu0 %v1028_v10  ;;  %1439 = vmatpush.msrb.mxu2 %v1417_v9  ;;  %v1542_v9 = vld [vmem:[%s2385_s2 + $0xf8] sm:$0xff] }
 0x834   :  { %1440 = vmatpush.msrb.mxu2 %v1416_v12  ;;  %v1540_v12 = vld [vmem:[%s2385_s2 + $0xe8] sm:$0xff] }
 0x835   :  { %v1307_v13 = vpop.xlane.xlu1 %1306 }
 0x836   :  { %v1311_v14 = vsub.f32 %v1303_v57, %v1307_v13  ;;  %1770 = vrot.lane.b32.xlu2 %v2172_v11, %s1886_s9  ;;  %v1762_v11 = vunpack.i.l.bf16 %v1761_v23 }
 0x838   :  { %v1313_v16 = vmul.f32 1.442695, %v1311_v14 }
 0x83a   :  { %1820 = vpow2.f32 %v1313_v16  ;;  %883 = vadd.xlane.f32.xlu0 %v882_v17  ;;  %v1415_v16 = vld [vmem:[%s2385_s2 + $0x80] sm:$0xff] }
 0x83b   :  { %1822 = vpow2.f32 %v1167_v18  ;;  %1441 = vmatpush.msrb.mxu2 %v1415_v16 }
 0x840   :  { %v1821_v19 = vpop.eup %1820  ;;  %v1751_v8 = vpop.permute.xlu0 %1750 }
 0x841   :  { %v1752_v20 = vunpack.i.l.bf16 %v1751_v8  ;;  %v1317_v21 = vsel %vm628_vm3, %v1821_v19, 0.0  ;;  %v1753_v24 = vunpack.i.h.bf16 %v1751_v8  ;;  %v1823_v26 = vpop.eup %1822 }
 0x842   :  { %1318 = vadd.xlane.f32.xlu0 %v1317_v21  ;;  %v1171_v33 = vsel %vm628_vm3, %v1823_v26, 0.0 }
 0x843   :  { %1202 = vmatpush.msrb.mxu3 %v1752_v20 }
 0x845   :  { %1203 = vmatpush.msrb.mxu3 %v1753_v24 }
 0x846   :  { %1700 = vmatmul.msk.f32.vlgmr.msrb.gmra.mxu3 %vm628_vm3, %v1823_v26 }
 0x847   :  { %1348 = vmatpush.msra.mxu3 %v1762_v11 }
 0x849   :  { %1349 = vmatpush.msra.mxu3 %v1763_v29 }
 0x84b   :  { %1559 = vmatpush.msrb.mxu3 %v1542_v9 }
 0x84d   :  { %v1766_v30 = vpop.permute.xlu1 %1765 }
 0x84e   :  { %v1767_v31 = vunpack.i.l.bf16 %v1766_v30  ;;  %1708 = vmatmul.msk.f32.vlgmr.msra.gmra.mxu3 %vm628_vm3, %v1821_v19  ;;  %v1768_v32 = vunpack.i.h.bf16 %v1766_v30 }
 0x850   :  { %1231 = vmatpush.msra.mxu1 %v1767_v31 }
 0x852   :  { %1232 = vmatpush.msra.mxu1 %v1768_v32 }
 0x85f   :  { %1172 = vadd.xlane.f32.xlu2 %v1171_v33 }
 0x867   :  { %880 = vadd.xlane.f32.xlu2 %v879_v35 }
 0x878   :  { %v1027_v34 = vpop.xlane.xlu1 %1026 }
 0x891   :  { %v1164_v36 = vpop.xlane.xlu2 %1163 }
 0x892   :  { %v1166_v38 = vsub.f32 %v1158_v62, %v1164_v36  ;;  %v2306_v36 = vld [vmem:[%s2386_s3] sm:$0xff] }
 0x894   :  { %v1169_v39 = vmul.f32 1.442695, %v1166_v38  ;;  %v1419_v38 = vperm.slane %v2306_v36, 4 }
 0x896   :  { %1824 = vpow2.f32 %v1169_v39 }
 0x899   :  { %v1310_v40 = vpop.xlane.xlu0 %1309  ;;  %v1771_v41 = vpop.permute.xlu2 %1770 }
 0x89a   :  { %v1312_v42 = vsub.f32 %v1304_v1, %v1310_v40  ;;  %v1772_v43 = vunpack.i.l.bf16 %v1771_v41  ;;  %v1773_v46 = vunpack.i.h.bf16 %v1771_v41 }
 0x89c   :  { %v1825_v44 = vpop.eup %1824  ;;  %v1315_v45 = vmul.f32 1.442695, %v1312_v42  ;;  %1377 = vmatpush.msrb.mxu1 %v1772_v43 }
 0x89d   :  { %1701 = vmatmul.msk.f32.vlgmr.msra.gmra.mxu1 %vm628_vm3, %v1825_v44  ;;  %v1174_v47 = vsel %vm628_vm3, %v1825_v44, 0.0 }
 0x89e   :  { %1826 = vpow2.f32 %v1315_v45  ;;  %1175 = vadd.xlane.f32.xlu0 %v1174_v47  ;;  %1378 = vmatpush.msrb.mxu1 %v1773_v46 }
 0x89f   :  { %1828 = vrcp.f32 %v1027_v34 }
 0x8a4   :  { %v1827_v28 = vpop.eup %1826 }
 0x8a5   :  { %1709 = vmatmul.msk.f32.vlgmr.msrb.gmra.mxu1 %vm628_vm3, %v1827_v28  ;;  %v1320_v48 = vsel %vm628_vm3, %v1827_v28, 0.0  ;;  %v1030_v51 = vpop.xlane.xlu0 %1029  ;;  %v1829_v4 = vpop.eup %1828 }
 0x8a6   :  { %1321 = vadd.xlane.f32.xlu1 %v1320_v48  ;;  %v1091_v53 = vmul.f32 %v1829_v4, %v2254_v60  ;;  %1830 = vrcp.f32 %v1030_v51 }
 0x8ac   :  { %v1831_v5 = vpop.eup %1830 }
 0x8ad   :  { %v884_v54 = vpop.xlane.xlu0 %883 }
 0x8ae   :  { %v1088_v55 = vpop.f32.mrf.mxu1 }
 0x8af   :  { %v1092_v56 = vmul.f32 %v1831_v5, %v1088_v55  ;;  %v1501_v55 = vld [vmem:[%s2385_s2 + $0xb0] sm:$0xff]  ;;  %v1500_v5 = vld [vmem:[%s2385_s2 + $0xa8] sm:$0xff] }
 0x8b5   :  { %v1319_v57 = vpop.xlane.xlu0 %1318 }
 0x8b6   :  { %1832 = vrcp.f32 %v1319_v57 }
 0x8bc   :  { %v1833_v58 = vpop.eup %1832 }
 0x8bf   :  { %1387 = vrot.lane.b32.xlu1 %v1091_v53, %s1891_s13 }
 0x8c7   :  { %1389 = vrot.lane.b32.xlu1 %v1092_v56, %s1891_s13  ;;  %v1499_v56 = vld [vmem:[%s2385_s2 + $0xa0] sm:$0xff] }
 0x8c9   :  { %v1205_v6 = vpop.f32.mrf.mxu3 }
 0x8d1   :  { %v1351_v61 = vpop.f32.mrf.mxu3 }
 0x8d2   :  { %v1383_v62 = vmul.f32 %v1833_v58, %v1351_v61  ;;  %v1173_v63 = vpop.xlane.xlu2 %1172 }
 0x8d3   :  { %1834 = vrcp.f32 %v1173_v63 }
 0x8d4   :  { %1403 = vrot.lane.b32.xlu0 %v1383_v62, %s1893_s15 }
 0x8d9   :  { %v1835_v60 = vpop.eup %1834 }
 0x8da   :  { %v1237_v0 = vmul.f32 %v1835_v60, %v1205_v6  ;;  %v881_v17 = vpop.xlane.xlu2 %880 }
 0x8dc   :  { %1395 = vrot.lane.b32.xlu2 %v1237_v0, %s1892_s14 }
 0x911   :  { %v1176_v1 = vpop.xlane.xlu0 %1175 }
 0x912   :  { %1836 = vrcp.f32 %v1176_v1 }
 0x918   :  { %v1837_v37 = vpop.eup %1836 }
 0x919   :  { %v1322_v2 = vpop.xlane.xlu1 %1321 }
 0x91a   :  { %v1234_v3 = vpop.f32.mrf.mxu1  ;;  %1838 = vrcp.f32 %v1322_v2 }
 0x91b   :  { %v1238_v10 = vmul.f32 %v1837_v37, %v1234_v3  ;;  %1840 = vrcp.f32 %v881_v17  ;;  %v1538_v17 = vld [vmem:[%s2385_s2 + $0xd8] sm:$0xff] }
 0x91c   :  { %1842 = vrcp.f32 %v884_v54 }
 0x91d   :  { %1397 = vrot.lane.b32.xlu0 %v1238_v10, %s1892_s14  ;;  %v1541_v10 = vld [vmem:[%s2385_s2 + $0xf0] sm:$0xff] }
 0x91e   :  { %1560 = vmatpush.msrb.mxu3 %v1541_v10 }
 0x920   :  { %v1839_v13 = vpop.eup %1838  ;;  %1561 = vmatpush.msrb.mxu3 %v1540_v12 }
 0x921   :  { %v1841_v18 = vpop.eup %1840 }
 0x922   :  { %v1380_v14 = vpop.f32.mrf.mxu1  ;;  %v945_v8 = vmul.f32 %v1841_v18, %v2240_v49  ;;  %v1843_v11 = vpop.eup %1842 }
 0x923   :  { %v1384_v15 = vmul.f32 %v1839_v13, %v1380_v14  ;;  %v946_v30 = vmul.f32 %v1843_v11, %v2252_v59 }
 0x925   :  { %1405 = vrot.lane.b32.xlu2 %v1384_v15, %s1893_s15  ;;  %v1539_v15 = vld [vmem:[%s2385_s2 + $0xe0] sm:$0xff]  ;;  %s1632_s15 = sshll.u32 %s2387_s4, 4  ;;  %s1633_s15 = int_to_ptr.hbm [resolvable:$true] %s1632_s15 }
 0x926   :  { %1562 = vmatpush.msrb.mxu3 %v1539_v15 }
 0x928   :  { %1563 = vmatpush.msrb.mxu3 %v1538_v17 }
 0x931   :  { %v1388_v19 = vpop.permute.xlu1 %1387 }
 0x932   :  { %v1409_v21 = vsel %vm70_vm1, %v945_v8, %v1388_v19 }
 0x936   :  { %v1396_v20 = vpop.permute.xlu2 %1395 }
 0x937   :  { %v1411_v23 = vsel %vm628_vm3, %v1409_v21, %v1396_v20 }
 0x939   :  { %v1390_v29 = vpop.permute.xlu1 %1389 }
 0x93a   :  { %v1410_v31 = vsel %vm70_vm1, %v946_v30, %v1390_v29  ;;  %v1537_v30 = vld [vmem:[%s2385_s2 + $0xd0] sm:$0xff] }
 0x93b   :  { %1564 = vmatpush.msrb.mxu3 %v1537_v30 }
 0x946   :  { %v1404_v24 = vpop.permute.xlu0 %1403 }
 0x947   :  { %v1413_v26 = vsel %vm631_vm4, %v1411_v23, %v1404_v24 }
 0x948   :  { %1710 = vmatmul.msk.f32.vlgmr.msrb.gmra.mxu2 %vm37_vm0, %v1413_v26 }
 0x97f   :  { %v1406_v33 = vpop.permute.xlu2 %1405 }
 0x98f   :  { %v1398_v32 = vpop.permute.xlu0 %1397 }
 0x990   :  { %v1412_v49 = vsel %vm628_vm3, %v1410_v31, %v1398_v32  ;;  %v1536_v31 = vld [vmem:[%s2385_s2 + $0xc8] sm:$0xff]  ;;  %v1535_v32 = vld [vmem:[%s2385_s2 + $0xc0] sm:$0xff]  ;;  %vm1544_vm3 = vcmask 523264  }
 0x991   :  { %v1414_v35 = vsel %vm631_vm4, %v1412_v49, %v1406_v33  ;;  %1565 = vmatpush.msrb.mxu3 %v1536_v31  ;;  %v1503_v33 = vperm.slane %v2306_v36, 7 }
 0x992   :  { %1711 = vmatmul.msk.f32.gmra.mxu2 %vm37_vm0, %v1414_v35 }
 0x993   :  { %1566 = vmatpush.msrb.mxu3 %v1535_v32 }
 0x9cb   :  { %v1443_v39 = vpop.f32.mrf.mxu2 }
 0x9cc   :  { %v1444_v40 = vadd.f32 %v1443_v39, %v1419_v38 }
 0x9ce   :  { %v1449_v59 = vadd.f32 %v1444_v40, %v2153_v27 }
 0x9d0   :  { %v1451_v41 = vsel %vm37_vm0, %v1449_v59, 0.0 }
 0x9d1   :  { %1452 = vadd.xlane.f32.xlu1 %v1451_v41  ;;  %v25_v41 = vld [vmem:[%s2386_s3 + $0x8] sm:$0xff] }
 0xa15   :  { %v1446_v42 = vpop.f32.mrf.mxu2 }
 0xa16   :  { %v1447_v43 = vadd.f32 %v1446_v42, %v1419_v38  ;;  %v1543_v42 = vperm.slane %v25_v41, 0 }
 0xa18   :  { %v1450_v44 = vadd.f32 %v1447_v43, %v2181_v50  ;;  %v1502_v50 = vld [vmem:[%s2385_s2 + $0xb8] sm:$0xff] }
 0xa19   :  { %1522 = vmatpush.msra.mxu0 %v1502_v50 }
 0xa1a   :  { %v1454_v45 = vsel %vm37_vm0, %v1450_v44, 0.0 }
 0xa1b   :  { %1455 = vadd.xlane.f32.xlu0 %v1454_v45  ;;  %1523 = vmatpush.msra.mxu0 %v1501_v55 }
 0xa1d   :  { %1524 = vmatpush.msra.mxu0 %v1500_v5 }
 0xa1f   :  { %1525 = vmatpush.msra.mxu0 %v1499_v56 }
 0xa44   :  { %v1453_v46 = vpop.xlane.xlu1 %1452 }
 0xa45   :  { %v1457_v47 = vmul.f32 %v1453_v46, %v2094_v52 }
 0xa47   :  { %v1459_v28 = vsub.f32 %v1449_v59, %v1457_v47 }
 0xa49   :  { %v1461_v48 = vmul.f32 %v1459_v28, %v1459_v28 }
 0xa4b   :  { %v1463_v34 = vsel %vm37_vm0, %v1461_v48, 0.0 }
 0xa4c   :  { %1464 = vadd.xlane.f32.xlu2 %v1463_v34 }
 0xa8e   :  { %v1456_v51 = vpop.xlane.xlu0 %1455 }
 0xa8f   :  { %v1458_v27 = vmul.f32 %v1456_v51, %v2094_v52 }
 0xa91   :  { %v1460_v4 = vsub.f32 %v1450_v44, %v1458_v27 }
 0xa93   :  { %v1462_v53 = vmul.f32 %v1460_v4, %v1460_v4 }
 0xa95   :  { %v1466_v54 = vsel %vm37_vm0, %v1462_v53, 0.0 }
 0xa96   :  { %1467 = vadd.xlane.f32.xlu1 %v1466_v54 }
 0xabf   :  { %v1465_v57 = vpop.xlane.xlu2 %1464 }
 0xac0   :  { %v1469_v6 = vmul.f32 %v1465_v57, %v2094_v52 }
 0xac2   :  { %v1471_v58 = vadd.f32 1e-05, %v1469_v6 }
 0xac4   :  { %1844 = vrsqrt.f32 %v1471_v58  ;;  %vm1479_vm13 = vweird.f32 %v1471_v58 }
 0xaca   :  { %v1845_v61 = vpop.eup %1844 }
 0xacb   :  { %v1474_v62 = vmul.f32 %v1845_v61, %v1471_v58  ;;  %vm1480_vm12 = vweird.f32 %v1845_v61 }
 0xacc   :  { %vm1481_vm14 = vmor %vm1479_vm13, %vm1480_vm12 }
 0xacd   :  { %v1475_v63 = vmul.f32 %v1845_v61, %v1474_v62 }
 0xacf   :  { %v1476_v60 = vmul.f32 0.5, %v1475_v63 }
 0xad1   :  { %v1477_v0 = vsub.f32 1.5, %v1476_v60 }
 0xad3   :  { %v1478_v1 = vmul.f32 %v1845_v61, %v1477_v0 }
 0xad5   :  { %v1482_v2 = vsel %vm1481_vm14, %v1845_v61, %v1478_v1 }
 0xad6   :  { %v1493_v37 = vmul.f32 %v1482_v2, %v1459_v28 }
 0xad8   :  { %v1495_v3 = vmul.f32 %v1493_v37, %v2146_v22 }
 0xada   :  { %v1497_v7 = vadd.f32 %v1495_v3, %v2149_v25 }
 0xadc   :  { %1712 = vmatmul.msk.f32.vlgmr.msra.gmra.mxu0 %vm37_vm0, %v1497_v7 }
 0xb09   :  { %v1468_v13 = vpop.xlane.xlu1 %1467 }
 0xb0a   :  { %v1470_v14 = vmul.f32 %v1468_v13, %v2094_v52 }
 0xb0c   :  { %v1472_v16 = vadd.f32 1e-05, %v1470_v14 }
 0xb0e   :  { %1846 = vrsqrt.f32 %v1472_v16  ;;  %vm1489_vm1 = vweird.f32 %v1472_v16 }
 0xb14   :  { %v1847_v18 = vpop.eup %1846 }
 0xb15   :  { %v1484_v19 = vmul.f32 %v1847_v18, %v1472_v16  ;;  %vm1490_vm15 = vweird.f32 %v1847_v18 }
 0xb16   :  { %vm1491_vm2 = vmor %vm1489_vm1, %vm1490_vm15 }
 0xb17   :  { %v1485_v8 = vmul.f32 %v1847_v18, %v1484_v19 }
 0xb19   :  { %v1486_v20 = vmul.f32 0.5, %v1485_v8 }
 0xb1b   :  { %v1487_v21 = vsub.f32 1.5, %v1486_v20 }
 0xb1d   :  { %v1488_v23 = vmul.f32 %v1847_v18, %v1487_v21 }
 0xb1f   :  { %v1492_v24 = vsel %vm1491_vm2, %v1847_v18, %v1488_v23 }
 0xb20   :  { %v1494_v26 = vmul.f32 %v1492_v24, %v1460_v4 }
 0xb22   :  { %v1496_v11 = vmul.f32 %v1494_v26, %v2146_v22 }
 0xb24   :  { %v1498_v29 = vadd.f32 %v1496_v11, %v2149_v25 }
 0xb26   :  { %1713 = vmatmul.msk.f32.gmra.mxu0 %vm37_vm0, %v1498_v29 }
 0xb59   :  { %v1527_v49 = vpop.f32.mrf.mxu0 }
 0xb5a   :  { %v1528_v35 = vadd.f32 %v1527_v49, %v1503_v33 }
 0xb5c   :  { %v1533_v38 = vmax.f32 %v1528_v35, 0.0 }
 0xb5e   :  { %1714 = vmatmul.msk.f32.vlgmr.msrb.gmra.mxu3 %vm1544_vm3, %v1533_v38 }
 0xba3   :  { %v1530_v39 = vpop.f32.mrf.mxu0 }
 0xba4   :  { %v1531_v40 = vadd.f32 %v1530_v39, %v1503_v33 }
 0xba6   :  { %v1534_v59 = vmax.f32 %v1531_v40, 0.0 }
 0xba8   :  { %1715 = vmatmul.msk.f32.gmra.mxu3 %vm1544_vm3, %v1534_v59 }
 0xbe1   :  { %v1568_v43 = vpop.f32.mrf.mxu3 }
 0xbe2   :  { %v1569_v44 = vadd.f32 %v1568_v43, %v1543_v42 }
 0xbe4   :  { %v1574_v45 = vadd.f32 %v1569_v44, %v1497_v7 }
 0xbe6   :  { %v1576_v46 = vsel %vm37_vm0, %v1574_v45, 0.0 }
 0xbe7   :  { %1577 = vadd.xlane.f32.xlu0 %v1576_v46 }
 0xc2b   :  { %v1571_v36 = vpop.f32.mrf.mxu3 }
 0xc2c   :  { %v1572_v47 = vadd.f32 %v1571_v36, %v1543_v42 }
 0xc2e   :  { %v1575_v28 = vadd.f32 %v1572_v47, %v1498_v29 }
 0xc30   :  { %v1579_v48 = vsel %vm37_vm0, %v1575_v28, 0.0 }
 0xc31   :  { %1580 = vadd.xlane.f32.xlu2 %v1579_v48 }
 0xc5a   :  { %v1578_v34 = vpop.xlane.xlu0 %1577 }
 0xc5b   :  { %v1582_v51 = vmul.f32 %v1578_v34, %v2094_v52 }
 0xc5d   :  { %v1584_v27 = vsub.f32 %v1574_v45, %v1582_v51 }
 0xc5f   :  { %v1586_v4 = vmul.f32 %v1584_v27, %v1584_v27 }
 0xc61   :  { %v1588_v53 = vsel %vm37_vm0, %v1586_v4, 0.0 }
 0xc62   :  { %1589 = vadd.xlane.f32.xlu1 %v1588_v53 }
 0xca4   :  { %v1581_v54 = vpop.xlane.xlu2 %1580 }
 0xca5   :  { %v1583_v50 = vmul.f32 %v1581_v54, %v2094_v52 }
 0xca7   :  { %v1585_v55 = vsub.f32 %v1575_v28, %v1583_v50 }
 0xca9   :  { %v1587_v5 = vmul.f32 %v1585_v55, %v1585_v55 }
 0xcab   :  { %v1591_v56 = vsel %vm37_vm0, %v1587_v5, 0.0 }
 0xcac   :  { %1592 = vadd.xlane.f32.xlu0 %v1591_v56 }
 0xcd5   :  { %v1590_v57 = vpop.xlane.xlu1 %1589 }
 0xcd6   :  { %v1594_v6 = vmul.f32 %v1590_v57, %v2094_v52 }
 0xcd8   :  { %v1596_v58 = vadd.f32 1e-05, %v1594_v6 }
 0xcda   :  { %1848 = vrsqrt.f32 %v1596_v58  ;;  %vm1604_vm5 = vweird.f32 %v1596_v58 }
 0xce0   :  { %v1849_v61 = vpop.eup %1848 }
 0xce1   :  { %v1599_v62 = vmul.f32 %v1849_v61, %v1596_v58  ;;  %vm1605_vm4 = vweird.f32 %v1849_v61 }
 0xce2   :  { %vm1606_vm6 = vmor %vm1604_vm5, %vm1605_vm4 }
 0xce3   :  { %v1600_v63 = vmul.f32 %v1849_v61, %v1599_v62 }
 0xce5   :  { %v1601_v60 = vmul.f32 0.5, %v1600_v63 }
 0xce7   :  { %v1602_v0 = vsub.f32 1.5, %v1601_v60 }
 0xce9   :  { %v1603_v1 = vmul.f32 %v1849_v61, %v1602_v0 }
 0xceb   :  { %v1607_v2 = vsel %vm1606_vm6, %v1849_v61, %v1603_v1 }
 0xcec   :  { %v1618_v37 = vmul.f32 %v1607_v2, %v1584_v27 }
 0xcee   :  { %v1620_v3 = vmul.f32 %v1618_v37, %v2146_v22 }
 0xcf0   :  { %v1622_v7 = vadd.f32 %v1620_v3, %v2149_v25 }
 0xcf2   :  { %1624 = vst.msk [vmem:[#allocation2] sm:$0xff] %vm37_vm0, %v1622_v7 }
 0xd1f   :  { %v1593_v9 = vpop.xlane.xlu0 %1592 }
 0xd20   :  { %v1595_v10 = vmul.f32 %v1593_v9, %v2094_v52 }
 0xd22   :  { %v1597_v12 = vadd.f32 1e-05, %v1595_v10 }
 0xd24   :  { %1850 = vrsqrt.f32 %v1597_v12  ;;  %vm1614_vm8 = vweird.f32 %v1597_v12 }
 0xd2a   :  { %v1851_v13 = vpop.eup %1850 }
 0xd2b   :  { %v1609_v14 = vmul.f32 %v1851_v13, %v1597_v12  ;;  %vm1615_vm7 = vweird.f32 %v1851_v13 }
 0xd2c   :  { %vm1616_vm9 = vmor %vm1614_vm8, %vm1615_vm7 }
 0xd2d   :  { %v1610_v15 = vmul.f32 %v1851_v13, %v1609_v14 }
 0xd2f   :  { %v1611_v16 = vmul.f32 0.5, %v1610_v15 }
 0xd31   :  { %v1612_v17 = vsub.f32 1.5, %v1611_v16 }
 0xd33   :  { %v1613_v18 = vmul.f32 %v1851_v13, %v1612_v17 }
 0xd35   :  { %v1617_v19 = vsel %vm1616_vm9, %v1851_v13, %v1613_v18 }
 0xd36   :  { %v1619_v8 = vmul.f32 %v1617_v19, %v1585_v55 }
 0xd38   :  { %v1621_v52 = vmul.f32 %v1619_v8, %v2146_v22 }
 0xd3a   :  { %v1623_v20 = vadd.f32 %v1621_v52, %v2149_v25 }
 0xd3c   :  { %1625 = vst.msk [vmem:[#allocation2 + $0x8] sm:$0xff] %vm37_vm0, %v1623_v20 }
 0xd3d   :  { %1638 = dma.vmem_to_hbm [thread:$0]  %s1631_s12, 256, %s1633_s15, [#allocation3], %s1896_s16, %s1896_s16, %s1891_s13  }
 0xd3e   :  { %1877 = dma.done.wait [#allocation3], 256  }
 0xd3f   :  { %1878 = vsyncadd [#allocation3], 4294967040 }
 0xd40   :  { %1643 = vsyncpa [#allocation3], 1 }

</bundles_post_ra>
